<compile_context>
chip_gen: v5e
topology: v5e:2x2
jax: 0.10.0
libtpu: 0.0.40
codegen_flags: <defaults>
</compile_context>

<pallas_src>
import functools

import jax
import jax.numpy as jnp
from jax.experimental import pallas as pl
from jax.experimental.pallas import tpu as pltpu


def _round_up(v, m):
    return ((v + m - 1) // m) * m


def _device_info():
    """(vmem_capacity_bytes, has_multiple_tensorcores) with safe fallbacks."""
    vmem = 64 * 1024 * 1024
    try:
        vmem = int(pltpu.get_tpu_info().vmem_capacity_bytes)
    except Exception:
        pass
    multi_tc = False
    try:
        kind = jax.devices()[0].device_kind.lower()
        if "v4" in kind or "v7" in kind:
            multi_tc = True                       # megacore / 2 TC per chip
        elif "v5" in kind and "lite" not in kind and "v5e" not in kind:
            multi_tc = True                       # v5p megacore
    except Exception:
        pass
    return vmem, multi_tc


def _row_block_bytes(rows, d, tile_h):
    """Rough per-grid-step VMEM footprint for the row-block size search."""
    io = 2 * 2 * rows * d * 4                       # x + out blocks, 2 buffers, f32
    scratch = rows * d * (4 + 2)                    # f32 accumulator + bf16 conv cache
    tmps = 4 * rows * d * 4 + 2 * rows * tile_h * 4  # LN/conv temps + h/gelu
    weights = 2 * 2 * d * tile_h * 2                # pw_w + out_w bf16, <=2 buffers
    return io + scratch + tmps + weights + (1 << 14)


def _lite_fusion_kernel(
    x_ref,       # (R, D)    fused rows (nB batch elements x Tp timesteps), f32
    gamma_ref,   # (1, D)    LayerNorm weight
    beta_ref,    # (1, D)    LayerNorm bias
    dw_w_ref,    # (3, D)    depthwise conv taps (tap, channel)
    dw_b_ref,    # (1, D)    depthwise conv bias
    pw_w_ref,    # (D, tH)   pointwise conv weight tile, bf16, pre-transposed
    pw_b_ref,    # (1, tH)   pointwise conv bias
    out_w_ref,   # (tH, D)   output projection weight tile, bf16, pre-transposed
    out_b_ref,   # (1, D)    output projection bias
    o_ref,       # (R, D)    output rows
    y_ref,       # (R, D)    bf16 scratch: cached LayerNorm + depthwise result
    acc_ref,     # (R, D)    f32 scratch: output accumulator across H tiles
    *,
    seq_real,    # T  (real timesteps per sequence)
    seq_pad,     # Tp (padded timesteps per sequence inside the row slab)
    approx_gelu,
):
    j = pl.program_id(1)  # H-tile index ("arbitrary" reduction axis)

    @pl.when(j == 0)
    def _():
        x = x_ref[...].astype(jnp.float32)                  # (R, D)
        r, d = x.shape

        # ---- LayerNorm (all lanes are real channels; no masking needed) ----
        inv_d = 1.0 / d
        mean = jnp.sum(x, axis=-1, keepdims=True) * inv_d
        var = jnp.sum(x * x, axis=-1, keepdims=True) * inv_d - mean * mean
        inv = jax.lax.rsqrt(jnp.maximum(var, 0.0) + 1e-5)
        xn = (x - mean) * inv * gamma_ref[...] + beta_ref[...]

        # ---- Depthwise Conv1d along T (k=3, pad=1, groups=D) ----
        # Shifts via XLU roll; per-sequence boundaries masked with a (R,1)
        # row mask (also blocks cross-batch / pad-row leakage and supplies the
        # conv's zero padding).
        t = jax.lax.broadcasted_iota(jnp.int32, (r, 1), 0) % seq_pad
        x_prev = jnp.where(t == 0, 0.0, pltpu.roll(xn, shift=1, axis=0))
        x_next = jnp.where(t == seq_real - 1, 0.0,
                           pltpu.roll(xn, shift=r - 1, axis=0))
        y = (x_prev * dw_w_ref[0:1, :] + xn * dw_w_ref[1:2, :]
             + x_next * dw_w_ref[2:3, :] + dw_b_ref[...])
        y_ref[...] = y.astype(jnp.bfloat16)
        acc_ref[...] = jnp.broadcast_to(out_b_ref[...], acc_ref.shape)

    # ---- Pointwise conv (Linear D->H tile), bf16-fed MXU, f32 accumulate ----
    h = (jnp.dot(y_ref[...], pw_w_ref[...], preferred_element_type=jnp.float32)
         + pw_b_ref[...])
    g = jax.nn.gelu(h, approximate=approx_gelu)
    # TODO(synk): Dropout(p=0.2) is eval-mode identity; training RNG not implemented.

    # ---- Output projection (Linear H tile -> D), accumulated over H tiles ----
    acc_ref[...] += jnp.dot(g.astype(jnp.bfloat16), out_w_ref[...],
                            preferred_element_type=jnp.float32)

    @pl.when(j == pl.num_programs(1) - 1)
    def _():
        o_ref[...] = acc_ref[...].astype(o_ref.dtype)


def prepare_params(params, *, vmem_cap=None):
    """One-time weight preparation: bf16 cast of the matmul weights and, for
    large hidden dims only, zero-padding of H to a multiple of the H tile."""
    if vmem_cap is None:
        vmem_cap, _ = _device_info()
    d, h = params["pw_w"].shape
    # Both (D,H) matrices resident in bf16 (x2 buffering headroom) must fit.
    if 2 * 2 * d * h * 2 <= int(0.35 * vmem_cap):
        tile_h = h
    else:
        tile_h = 512
    hp = _round_up(h, tile_h)
    pad_h = hp - h
    return {
        "gamma": params["gamma"].astype(jnp.float32),
        "beta": params["beta"].astype(jnp.float32),
        "dw_w": params["dw_w"].astype(jnp.float32),
        "dw_b": params["dw_b"].astype(jnp.float32),
        "pw_w": jnp.pad(params["pw_w"], ((0, 0), (0, pad_h))).astype(jnp.bfloat16),
        "pw_b": jnp.pad(params["pw_b"], ((0, 0), (0, pad_h))).astype(jnp.float32),
        "out_w": jnp.pad(params["out_w"], ((0, pad_h), (0, 0))).astype(jnp.bfloat16),
        "out_b": params["out_b"].astype(jnp.float32),
        "tile_h": tile_h,
    }


def lite_fusion(x, prepared, *, approx_gelu=True):
    """x: (B, T, D) float32; prepared: output of prepare_params."""
    B, T, D = x.shape
    hp = prepared["pw_w"].shape[1]
    tile_h = int(prepared["tile_h"])
    n_h = hp // tile_h

    vmem_cap, multi_tc = _device_info()
    budget = max(8 << 20, int(0.5 * vmem_cap))

    # --- rows: pad T to a sublane multiple, fuse whole batch elements ---
    Tp = _round_up(T, 8)
    min_row_blocks = 2 if (multi_tc and B >= 2) else 1
    nB = 1
    for cand in range(B, 0, -1):
        if B % cand:
            continue
        if B // cand < min_row_blocks:
            continue
        if _row_block_bytes(cand * Tp, D, tile_h) <= budget:
            nB = cand
            break
    R = nB * Tp
    grid = (B // nB, n_h)

    xr = x.astype(jnp.float32)
    if Tp != T:
        xr = jnp.pad(xr, ((0, 0), (0, Tp - T), (0, 0)))
    xf = xr.reshape(B * Tp, D)

    kernel = functools.partial(_lite_fusion_kernel, seq_real=T, seq_pad=Tp,
                               approx_gelu=approx_gelu)

    def build_and_run(single_buffer_weights):
        def const_spec(shape):
            nd = len(shape)
            kwargs = {}
            if single_buffer_weights:
                # Constant index across the grid -> no double-buffering needed.
                kwargs["pipeline_mode"] = pl.Buffered(1)
            return pl.BlockSpec(shape, lambda i, j: (0,) * nd, **kwargs)

        if n_h > 1:
            pw_w_spec = pl.BlockSpec((D, tile_h), lambda i, j: (0, j))
            pw_b_spec = pl.BlockSpec((1, tile_h), lambda i, j: (0, j))
            out_w_spec = pl.BlockSpec((tile_h, D), lambda i, j: (j, 0))
        else:
            pw_w_spec = const_spec((D, hp))
            pw_b_spec = const_spec((1, hp))
            out_w_spec = const_spec((hp, D))

        out = pl.pallas_call(
            kernel,
            out_shape=jax.ShapeDtypeStruct((B * Tp, D), x.dtype),
            grid_spec=pltpu.PrefetchScalarGridSpec(
                num_scalar_prefetch=0,
                grid=grid,
                in_specs=[
                    pl.BlockSpec((R, D), lambda i, j: (i, 0)),   # x rows
                    const_spec((1, D)),    # gamma
                    const_spec((1, D)),    # beta
                    const_spec((3, D)),    # dw_w
                    const_spec((1, D)),    # dw_b
                    pw_w_spec,             # pw_w (bf16)
                    pw_b_spec,             # pw_b
                    out_w_spec,            # out_w (bf16)
                    const_spec((1, D)),    # out_b
                ],
                out_specs=pl.BlockSpec((R, D), lambda i, j: (i, 0)),
                scratch_shapes=[
                    pltpu.VMEM((R, D), jnp.bfloat16),   # cached depthwise result
                    pltpu.VMEM((R, D), jnp.float32),    # output accumulator
                ],
            ),
            compiler_params=pltpu.CompilerParams(
                dimension_semantics=("parallel", "arbitrary"),
                vmem_limit_bytes=max(32 << 20, int(0.75 * vmem_cap)),
            ),
        )(xf, prepared["gamma"], prepared["beta"], prepared["dw_w"],
          prepared["dw_b"], prepared["pw_w"], prepared["pw_b"],
          prepared["out_w"], prepared["out_b"])
        return jax.block_until_ready(out)

    try:
        out = build_and_run(True)
    except Exception:
        # Fallback for jax versions without pl.Buffered(1) single-buffering.
        out = build_and_run(False)

    out = out.reshape(B, Tp, D)
    if Tp != T:
        out = out[:, :T, :]
    return out


def init_params(key, input_dim, hidden_dim):
    """Deterministic synthetic parameters matching LiteFusion's shapes."""
    ks = jax.random.split(key, 6)
    D, H = input_dim, hidden_dim
    scale = 0.05
    return {
        # nn.LayerNorm(D): weight=1, bias=0 at init
        "gamma": jnp.ones((1, D), jnp.float32),
        "beta": jnp.zeros((1, D), jnp.float32),
        # nn.Conv1d(D, D, 3, groups=D): weight (D, 1, 3) -> stored as (3, D)
        "dw_w": scale * jax.random.normal(ks[0], (3, D), jnp.float32),
        "dw_b": scale * jax.random.normal(ks[1], (1, D), jnp.float32),
        # nn.Conv1d(D, H, 1): weight (H, D, 1) -> stored transposed as (D, H)
        "pw_w": scale * jax.random.normal(ks[2], (D, H), jnp.float32),
        "pw_b": scale * jax.random.normal(ks[3], (1, H), jnp.float32),
        # nn.Linear(H, D): weight (D, H) -> stored transposed as (H, D)
        "out_w": scale * jax.random.normal(ks[4], (H, D), jnp.float32),
        "out_b": scale * jax.random.normal(ks[5], (1, D), jnp.float32),
    }


def lite_fusion_ref(x, p):
    """Pure-JAX f32 reference of the PyTorch forward (eval mode, exact GELU)."""
    mean = jnp.mean(x, axis=-1, keepdims=True)
    var = jnp.mean((x - mean) ** 2, axis=-1, keepdims=True)
    xn = (x - mean) * jax.lax.rsqrt(var + 1e-5) * p["gamma"][0] + p["beta"][0]
    zero = jnp.zeros_like(xn[:, :1, :])
    x_prev = jnp.concatenate([zero, xn[:, :-1, :]], axis=1)
    x_next = jnp.concatenate([xn[:, 1:, :], zero], axis=1)
    y = (x_prev * p["dw_w"][0] + xn * p["dw_w"][1] + x_next * p["dw_w"][2]
         + p["dw_b"][0])
    h = jnp.einsum("btd,dh->bth", y, p["pw_w"]) + p["pw_b"][0]
    g = jax.nn.gelu(h, approximate=False)
    return jnp.einsum("bth,hd->btd", g, p["out_w"]) + p["out_b"][0]


if __name__ == "__main__":
    key = jax.random.PRNGKey(0)

    # (B, T, D, H): second case exercises the T->multiple-of-8 padding path.
    cases = [(2, 16, 32, 64), (3, 12, 32, 64)]
    for (B, T, D, H) in cases:
        kx, kp, key = jax.random.split(key, 3)
        x = jax.random.normal(kx, (B, T, D), jnp.float32)
        params = init_params(kp, D, H)
        prepared = prepare_params(params)

        out = jax.block_until_ready(lite_fusion(x, prepared))
        ref = lite_fusion_ref(x, params)

        assert out.shape == (B, T, D)
        # bf16-fed MXU + tanh-approx GELU vs exact f32 reference.
        assert jnp.allclose(out, ref, atol=2e-2, rtol=2e-2), (
            f"mismatch for case {(B, T, D, H)}: "
            f"max abs err {float(jnp.max(jnp.abs(out - ref)))}")

    print("KERNEL_OK")
</pallas_src>

<mosaic_0001>
module attributes {stable_mosaic.version = 11 : i64} {
  func.func @_lite_fusion_kernel(%arg0: i32, %arg1: i32, %arg2: memref<32x32xf32, #tpu.memory_space<vmem>>, %arg3: memref<1x32xf32, #tpu.memory_space<vmem>>, %arg4: memref<1x32xf32, #tpu.memory_space<vmem>>, %arg5: memref<3x32xf32, #tpu.memory_space<vmem>>, %arg6: memref<1x32xf32, #tpu.memory_space<vmem>>, %arg7: memref<32x64xbf16, #tpu.memory_space<vmem>>, %arg8: memref<1x64xf32, #tpu.memory_space<vmem>>, %arg9: memref<64x32xbf16, #tpu.memory_space<vmem>>, %arg10: memref<1x32xf32, #tpu.memory_space<vmem>>, %arg11: memref<32x32xf32, #tpu.memory_space<vmem>>, %arg12: memref<32x32xbf16, #tpu.memory_space<vmem>>, %arg13: memref<32x32xf32, #tpu.memory_space<vmem>>) attributes {dimension_semantics = [#tpu.dimension_semantics<parallel>, #tpu.dimension_semantics<arbitrary>], iteration_bounds = array<i64: 1, 1>, scalar_prefetch = 0 : i64, scratch_operands = 2 : i64, tpu.core_type = #tpu.core_type<tc>, window_params = [{transform_indices = @transform_0, window_bounds = array<i64: 32, 32>}, {pipeline_mode = #tpu.pipeline_mode<synchronous>, transform_indices = @transform_1, window_bounds = array<i64: 1, 32>}, {pipeline_mode = #tpu.pipeline_mode<synchronous>, transform_indices = @transform_2, window_bounds = array<i64: 1, 32>}, {pipeline_mode = #tpu.pipeline_mode<synchronous>, transform_indices = @transform_3, window_bounds = array<i64: 3, 32>}, {pipeline_mode = #tpu.pipeline_mode<synchronous>, transform_indices = @transform_4, window_bounds = array<i64: 1, 32>}, {pipeline_mode = #tpu.pipeline_mode<synchronous>, transform_indices = @transform_5, window_bounds = array<i64: 32, 64>}, {pipeline_mode = #tpu.pipeline_mode<synchronous>, transform_indices = @transform_6, window_bounds = array<i64: 1, 64>}, {pipeline_mode = #tpu.pipeline_mode<synchronous>, transform_indices = @transform_7, window_bounds = array<i64: 64, 32>}, {pipeline_mode = #tpu.pipeline_mode<synchronous>, transform_indices = @transform_8, window_bounds = array<i64: 1, 32>}, {transform_indices = @transform_9, window_bounds = array<i64: 32, 32>}]} {
    %c0_i32 = arith.constant 0 : i32
    %0 = arith.cmpi eq, %arg1, %c0_i32 : i32
    %1 = arith.extui %0 : i1 to i32
    %c0_i32_0 = arith.constant 0 : i32
    %2 = arith.cmpi ne, %1, %c0_i32_0 : i32
    scf.if %2 {
      %c0_19 = arith.constant 0 : index
      %c0_20 = arith.constant 0 : index
      %31 = vector.load %arg2[%c0_19, %c0_20] : memref<32x32xf32, #tpu.memory_space<vmem>>, vector<32x32xf32>
      %cst_21 = arith.constant dense<0.000000e+00> : vector<32xf32>
      %32 = vector.multi_reduction <add>, %31, %cst_21 [1] : vector<32x32xf32> to vector<32xf32>
      %33 = vector.shape_cast %32 : vector<32xf32> to vector<32x1xf32>
      %cst_22 = arith.constant 3.125000e-02 : f32
      %34 = vector.broadcast %cst_22 : f32 to vector<32x1xf32>
      %35 = arith.mulf %33, %34 : vector<32x1xf32>
      %36 = arith.mulf %31, %31 : vector<32x32xf32>
      %cst_23 = arith.constant dense<0.000000e+00> : vector<32xf32>
      %37 = vector.multi_reduction <add>, %36, %cst_23 [1] : vector<32x32xf32> to vector<32xf32>
      %38 = vector.shape_cast %37 : vector<32xf32> to vector<32x1xf32>
      %cst_24 = arith.constant 3.125000e-02 : f32
      %39 = vector.broadcast %cst_24 : f32 to vector<32x1xf32>
      %40 = arith.mulf %38, %39 : vector<32x1xf32>
      %41 = arith.mulf %35, %35 : vector<32x1xf32>
      %42 = arith.subf %40, %41 : vector<32x1xf32>
      %cst_25 = arith.constant 0.000000e+00 : f32
      %43 = vector.broadcast %cst_25 : f32 to vector<32x1xf32>
      %44 = arith.maximumf %42, %43 : vector<32x1xf32>
      %cst_26 = arith.constant 9.99999974E-6 : f32
      %45 = vector.broadcast %cst_26 : f32 to vector<32x1xf32>
      %46 = arith.addf %44, %45 : vector<32x1xf32>
      %47 = math.rsqrt %46 : vector<32x1xf32>
      %48 = vector.broadcast %35 : vector<32x1xf32> to vector<32x32xf32>
      %49 = arith.subf %31, %48 : vector<32x32xf32>
      %50 = vector.broadcast %47 : vector<32x1xf32> to vector<32x32xf32>
      %51 = arith.mulf %49, %50 : vector<32x32xf32>
      %c0_27 = arith.constant 0 : index
      %c0_28 = arith.constant 0 : index
      %52 = vector.load %arg3[%c0_27, %c0_28] : memref<1x32xf32, #tpu.memory_space<vmem>>, vector<1x32xf32>
      %53 = vector.broadcast %52 : vector<1x32xf32> to vector<32x32xf32>
      %54 = arith.mulf %51, %53 : vector<32x32xf32>
      %c0_29 = arith.constant 0 : index
      %c0_30 = arith.constant 0 : index
      %55 = vector.load %arg4[%c0_29, %c0_30] : memref<1x32xf32, #tpu.memory_space<vmem>>, vector<1x32xf32>
      %56 = vector.broadcast %55 : vector<1x32xf32> to vector<32x32xf32>
      %57 = arith.addf %54, %56 : vector<32x32xf32>
      %58 = tpu.iota {dimensions = array<i32: 0>} : vector<32x1xi32>
      %c16_i32 = arith.constant 16 : i32
      %c0_i32_31 = arith.constant 0 : i32
      %59 = arith.cmpi eq, %c16_i32, %c0_i32_31 : i32
      %c1_i32 = arith.constant 1 : i32
      %60 = arith.select %59, %c1_i32, %c16_i32 : i32
      %61 = vector.broadcast %60 : i32 to vector<32x1xi32>
      %62 = arith.remsi %58, %61 : vector<32x1xi32>
      %c0_i32_32 = arith.constant 0 : i32
      %63 = vector.broadcast %c0_i32_32 : i32 to vector<32x1xi32>
      %64 = arith.cmpi ne, %62, %63 : vector<32x1xi32>
      %c0_i32_33 = arith.constant 0 : i32
      %65 = vector.broadcast %c0_i32_33 : i32 to vector<32x1xi32>
      %66 = arith.cmpi slt, %62, %65 : vector<32x1xi32>
      %c0_i32_34 = arith.constant 0 : i32
      %67 = arith.cmpi slt, %60, %c0_i32_34 : i32
      %68 = vector.broadcast %67 : i1 to vector<32x1xi1>
      %69 = vector.broadcast %68 : vector<32x1xi1> to vector<32x1xi1>
      %70 = arith.xori %66, %69 : vector<32x1xi1>
      %71 = arith.andi %70, %64 : vector<32x1xi1>
      %72 = vector.broadcast %60 : i32 to vector<32x1xi32>
      %73 = arith.addi %62, %72 : vector<32x1xi32>
      %74 = arith.select %71, %73, %62 : vector<32x1xi1>, vector<32x1xi32>
      %c0_i32_35 = arith.constant 0 : i32
      %75 = vector.broadcast %c0_i32_35 : i32 to vector<32x1xi32>
      %76 = arith.cmpi eq, %74, %75 : vector<32x1xi32>
      %c1_i32_36 = arith.constant 1 : i32
      %77 = tpu.dynamic_rotate %57 by %c1_i32_36 dim 0 : vector<32x32xf32>, i32 -> vector<32x32xf32>
      %cst_37 = arith.constant 0.000000e+00 : f32
      %78 = vector.shape_cast %76 : vector<32x1xi1> to vector<32x1xi1>
      %79 = vector.broadcast %78 : vector<32x1xi1> to vector<32x32xi1>
      %80 = vector.broadcast %cst_37 : f32 to vector<32x32xf32>
      %81 = arith.select %79, %80, %77 : vector<32x32xi1>, vector<32x32xf32>
      %c15_i32 = arith.constant 15 : i32
      %82 = vector.broadcast %c15_i32 : i32 to vector<32x1xi32>
      %83 = arith.cmpi eq, %74, %82 : vector<32x1xi32>
      %c31_i32 = arith.constant 31 : i32
      %84 = tpu.dynamic_rotate %57 by %c31_i32 dim 0 : vector<32x32xf32>, i32 -> vector<32x32xf32>
      %cst_38 = arith.constant 0.000000e+00 : f32
      %85 = vector.shape_cast %83 : vector<32x1xi1> to vector<32x1xi1>
      %86 = vector.broadcast %85 : vector<32x1xi1> to vector<32x32xi1>
      %87 = vector.broadcast %cst_38 : f32 to vector<32x32xf32>
      %88 = arith.select %86, %87, %84 : vector<32x32xi1>, vector<32x32xf32>
      %c0_39 = arith.constant 0 : index
      %c0_40 = arith.constant 0 : index
      %89 = vector.load %arg5[%c0_39, %c0_40] : memref<3x32xf32, #tpu.memory_space<vmem>>, vector<1x32xf32>
      %90 = vector.broadcast %89 : vector<1x32xf32> to vector<32x32xf32>
      %91 = arith.mulf %81, %90 : vector<32x32xf32>
      %c1 = arith.constant 1 : index
      %c0_41 = arith.constant 0 : index
      %92 = vector.load %arg5[%c1, %c0_41] : memref<3x32xf32, #tpu.memory_space<vmem>>, vector<1x32xf32>
      %93 = vector.broadcast %92 : vector<1x32xf32> to vector<32x32xf32>
      %94 = arith.mulf %57, %93 : vector<32x32xf32>
      %95 = arith.addf %91, %94 : vector<32x32xf32>
      %c2 = arith.constant 2 : index
      %c0_42 = arith.constant 0 : index
      %96 = vector.load %arg5[%c2, %c0_42] : memref<3x32xf32, #tpu.memory_space<vmem>>, vector<1x32xf32>
      %97 = vector.broadcast %96 : vector<1x32xf32> to vector<32x32xf32>
      %98 = arith.mulf %88, %97 : vector<32x32xf32>
      %99 = arith.addf %95, %98 : vector<32x32xf32>
      %c0_43 = arith.constant 0 : index
      %c0_44 = arith.constant 0 : index
      %100 = vector.load %arg6[%c0_43, %c0_44] : memref<1x32xf32, #tpu.memory_space<vmem>>, vector<1x32xf32>
      %101 = vector.broadcast %100 : vector<1x32xf32> to vector<32x32xf32>
      %102 = arith.addf %99, %101 : vector<32x32xf32>
      %103 = arith.truncf %102 : vector<32x32xf32> to vector<32x32xbf16>
      %c0_45 = arith.constant 0 : index
      %c0_46 = arith.constant 0 : index
      %104 = vector.load %arg12[%c0_45, %c0_46] : memref<32x32xbf16, #tpu.memory_space<vmem>>, vector<32x32xbf16>
      tpu.vector_store %arg12[%c0_45, %c0_46], %103 {strides = array<i32>} : memref<32x32xbf16, #tpu.memory_space<vmem>>, vector<32x32xbf16>,
      %c0_47 = arith.constant 0 : index
      %c0_48 = arith.constant 0 : index
      %105 = vector.load %arg10[%c0_47, %c0_48] : memref<1x32xf32, #tpu.memory_space<vmem>>, vector<1x32xf32>
      %106 = vector.shape_cast %105 : vector<1x32xf32> to vector<1x32xf32>
      %107 = vector.broadcast %106 : vector<1x32xf32> to vector<32x32xf32>
      %c0_49 = arith.constant 0 : index
      %c0_50 = arith.constant 0 : index
      %108 = vector.load %arg13[%c0_49, %c0_50] : memref<32x32xf32, #tpu.memory_space<vmem>>, vector<32x32xf32>
      tpu.vector_store %arg13[%c0_49, %c0_50], %107 {strides = array<i32>} : memref<32x32xf32, #tpu.memory_space<vmem>>, vector<32x32xf32>,
    } else {
    }
    %c0 = arith.constant 0 : index
    %c0_1 = arith.constant 0 : index
    %3 = vector.load %arg12[%c0, %c0_1] : memref<32x32xbf16, #tpu.memory_space<vmem>>, vector<32x32xbf16>
    %c0_2 = arith.constant 0 : index
    %c0_3 = arith.constant 0 : index
    %4 = vector.load %arg7[%c0_2, %c0_3] : memref<32x64xbf16, #tpu.memory_space<vmem>>, vector<32x64xbf16>
    %cst = arith.constant dense<0.000000e+00> : vector<32x64xf32>
    %5 = tpu.matmul %3, %4, %cst {dimension_numbers = #tpu.dot_dimension_numbers<[1], [0], [0], [1], [0, 0, 1, 1], [], []>} : vector<32x32xbf16>, vector<32x64xbf16>, vector<32x64xf32> -> vector<32x64xf32>
    %c0_4 = arith.constant 0 : index
    %c0_5 = arith.constant 0 : index
    %6 = vector.load %arg8[%c0_4, %c0_5] : memref<1x64xf32, #tpu.memory_space<vmem>>, vector<1x64xf32>
    %7 = vector.broadcast %6 : vector<1x64xf32> to vector<32x64xf32>
    %8 = arith.addf %5, %7 : vector<32x64xf32>
    %9 = arith.mulf %8, %8 : vector<32x64xf32>
    %10 = arith.mulf %8, %9 : vector<32x64xf32>
    %cst_6 = arith.constant 4.471500e-02 : f32
    %11 = vector.broadcast %cst_6 : f32 to vector<32x64xf32>
    %12 = arith.mulf %11, %10 : vector<32x64xf32>
    %13 = arith.addf %8, %12 : vector<32x64xf32>
    %cst_7 = arith.constant 0.797884583 : f32
    %14 = vector.broadcast %cst_7 : f32 to vector<32x64xf32>
    %15 = arith.mulf %14, %13 : vector<32x64xf32>
    %16 = math.tanh %15 : vector<32x64xf32>
    %cst_8 = arith.constant 1.000000e+00 : f32
    %17 = vector.broadcast %cst_8 : f32 to vector<32x64xf32>
    %18 = arith.addf %17, %16 : vector<32x64xf32>
    %cst_9 = arith.constant 5.000000e-01 : f32
    %19 = vector.broadcast %cst_9 : f32 to vector<32x64xf32>
    %20 = arith.mulf %19, %18 : vector<32x64xf32>
    %21 = arith.mulf %8, %20 : vector<32x64xf32>
    %c0_10 = arith.constant 0 : index
    %c0_11 = arith.constant 0 : index
    %22 = vector.load %arg13[%c0_10, %c0_11] : memref<32x32xf32, #tpu.memory_space<vmem>>, vector<32x32xf32>
    %23 = arith.truncf %21 : vector<32x64xf32> to vector<32x64xbf16>
    %c0_12 = arith.constant 0 : index
    %c0_13 = arith.constant 0 : index
    %24 = vector.load %arg9[%c0_12, %c0_13] : memref<64x32xbf16, #tpu.memory_space<vmem>>, vector<64x32xbf16>
    %cst_14 = arith.constant dense<0.000000e+00> : vector<32x32xf32>
    %25 = tpu.matmul %23, %24, %cst_14 {dimension_numbers = #tpu.dot_dimension_numbers<[1], [0], [0], [1], [0, 0, 1, 1], [], []>} : vector<32x64xbf16>, vector<64x32xbf16>, vector<32x32xf32> -> vector<32x32xf32>
    %26 = arith.addf %22, %25 : vector<32x32xf32>
    %c0_15 = arith.constant 0 : index
    %c0_16 = arith.constant 0 : index
    %27 = vector.load %arg13[%c0_15, %c0_16] : memref<32x32xf32, #tpu.memory_space<vmem>>, vector<32x32xf32>
    tpu.vector_store %arg13[%c0_15, %c0_16], %26 {strides = array<i32>} : memref<32x32xf32, #tpu.memory_space<vmem>>, vector<32x32xf32>,
    %c0_i32_17 = arith.constant 0 : i32
    %28 = arith.cmpi eq, %arg1, %c0_i32_17 : i32
    %29 = arith.extui %28 : i1 to i32
    %c0_i32_18 = arith.constant 0 : i32
    %30 = arith.cmpi ne, %29, %c0_i32_18 : i32
    scf.if %30 {
      %c0_19 = arith.constant 0 : index
      %c0_20 = arith.constant 0 : index
      %31 = vector.load %arg13[%c0_19, %c0_20] : memref<32x32xf32, #tpu.memory_space<vmem>>, vector<32x32xf32>
      %c0_21 = arith.constant 0 : index
      %c0_22 = arith.constant 0 : index
      %32 = vector.load %arg11[%c0_21, %c0_22] : memref<32x32xf32, #tpu.memory_space<vmem>>, vector<32x32xf32>
      tpu.vector_store %arg11[%c0_21, %c0_22], %31 {strides = array<i32>} : memref<32x32xf32, #tpu.memory_space<vmem>>, vector<32x32xf32>,
    } else {
    }
    return
  }
  func.func @transform_0(%arg0: i32, %arg1: i32) -> (i32, i32) {
    %c0_i32 = arith.constant 0 : i32
    %c0_i32_0 = arith.constant 0 : i32
    return %arg0, %c0_i32 : i32, i32
  }
  func.func @transform_1(%arg0: i32, %arg1: i32) -> (i32, i32) {
    %c0_i32 = arith.constant 0 : i32
    %c0_i32_0 = arith.constant 0 : i32
    %c0_i32_1 = arith.constant 0 : i32
    return %c0_i32, %c0_i32_0 : i32, i32
  }
  func.func @transform_2(%arg0: i32, %arg1: i32) -> (i32, i32) {
    %c0_i32 = arith.constant 0 : i32
    %c0_i32_0 = arith.constant 0 : i32
    %c0_i32_1 = arith.constant 0 : i32
    return %c0_i32, %c0_i32_0 : i32, i32
  }
  func.func @transform_3(%arg0: i32, %arg1: i32) -> (i32, i32) {
    %c0_i32 = arith.constant 0 : i32
    %c0_i32_0 = arith.constant 0 : i32
    %c0_i32_1 = arith.constant 0 : i32
    return %c0_i32, %c0_i32_0 : i32, i32
  }
  func.func @transform_4(%arg0: i32, %arg1: i32) -> (i32, i32) {
    %c0_i32 = arith.constant 0 : i32
    %c0_i32_0 = arith.constant 0 : i32
    %c0_i32_1 = arith.constant 0 : i32
    return %c0_i32, %c0_i32_0 : i32, i32
  }
  func.func @transform_5(%arg0: i32, %arg1: i32) -> (i32, i32) {
    %c0_i32 = arith.constant 0 : i32
    %c0_i32_0 = arith.constant 0 : i32
    %c0_i32_1 = arith.constant 0 : i32
    return %c0_i32, %c0_i32_0 : i32, i32
  }
  func.func @transform_6(%arg0: i32, %arg1: i32) -> (i32, i32) {
    %c0_i32 = arith.constant 0 : i32
    %c0_i32_0 = arith.constant 0 : i32
    %c0_i32_1 = arith.constant 0 : i32
    return %c0_i32, %c0_i32_0 : i32, i32
  }
  func.func @transform_7(%arg0: i32, %arg1: i32) -> (i32, i32) {
    %c0_i32 = arith.constant 0 : i32
    %c0_i32_0 = arith.constant 0 : i32
    %c0_i32_1 = arith.constant 0 : i32
    return %c0_i32, %c0_i32_0 : i32, i32
  }
  func.func @transform_8(%arg0: i32, %arg1: i32) -> (i32, i32) {
    %c0_i32 = arith.constant 0 : i32
    %c0_i32_0 = arith.constant 0 : i32
    %c0_i32_1 = arith.constant 0 : i32
    return %c0_i32, %c0_i32_0 : i32, i32
  }
  func.func @transform_9(%arg0: i32, %arg1: i32) -> (i32, i32) {
    %c0_i32 = arith.constant 0 : i32
    %c0_i32_0 = arith.constant 0 : i32
    return %arg0, %c0_i32 : i32, i32
  }
}

module attributes {stable_mosaic.version = 11 : i64} {
  func.func @_lite_fusion_kernel(%arg0: i32, %arg1: i32, %arg2: memref<32x32xf32, #tpu.memory_space<vmem>>, %arg3: memref<1x32xf32, #tpu.memory_space<vmem>>, %arg4: memref<1x32xf32, #tpu.memory_space<vmem>>, %arg5: memref<3x32xf32, #tpu.memory_space<vmem>>, %arg6: memref<1x32xf32, #tpu.memory_space<vmem>>, %arg7: memref<32x64xbf16, #tpu.memory_space<vmem>>, %arg8: memref<1x64xf32, #tpu.memory_space<vmem>>, %arg9: memref<64x32xbf16, #tpu.memory_space<vmem>>, %arg10: memref<1x32xf32, #tpu.memory_space<vmem>>, %arg11: memref<32x32xf32, #tpu.memory_space<vmem>>, %arg12: memref<32x32xbf16, #tpu.memory_space<vmem>>, %arg13: memref<32x32xf32, #tpu.memory_space<vmem>>) attributes {dimension_semantics = [#tpu.dimension_semantics<parallel>, #tpu.dimension_semantics<arbitrary>], iteration_bounds = array<i64: 1, 1>, scalar_prefetch = 0 : i64, scratch_operands = 2 : i64, tpu.core_type = #tpu.core_type<tc>, window_params = [{transform_indices = @transform_0, window_bounds = array<i64: 32, 32>}, {pipeline_mode = #tpu.pipeline_mode<synchronous>, transform_indices = @transform_1, window_bounds = array<i64: 1, 32>}, {pipeline_mode = #tpu.pipeline_mode<synchronous>, transform_indices = @transform_2, window_bounds = array<i64: 1, 32>}, {pipeline_mode = #tpu.pipeline_mode<synchronous>, transform_indices = @transform_3, window_bounds = array<i64: 3, 32>}, {pipeline_mode = #tpu.pipeline_mode<synchronous>, transform_indices = @transform_4, window_bounds = array<i64: 1, 32>}, {pipeline_mode = #tpu.pipeline_mode<synchronous>, transform_indices = @transform_5, window_bounds = array<i64: 32, 64>}, {pipeline_mode = #tpu.pipeline_mode<synchronous>, transform_indices = @transform_6, window_bounds = array<i64: 1, 64>}, {pipeline_mode = #tpu.pipeline_mode<synchronous>, transform_indices = @transform_7, window_bounds = array<i64: 64, 32>}, {pipeline_mode = #tpu.pipeline_mode<synchronous>, transform_indices = @transform_8, window_bounds = array<i64: 1, 32>}, {transform_indices = @transform_9, window_bounds = array<i64: 32, 32>}]} {
    %c0_i32 = arith.constant 0 : i32
    %0 = arith.cmpi eq, %arg1, %c0_i32 : i32
    %1 = arith.extui %0 : i1 to i32
    %c0_i32_0 = arith.constant 0 : i32
    %2 = arith.cmpi ne, %1, %c0_i32_0 : i32
    scf.if %2 {
      %c0_19 = arith.constant 0 : index
      %c0_20 = arith.constant 0 : index
      %31 = vector.load %arg2[%c0_19, %c0_20] : memref<32x32xf32, #tpu.memory_space<vmem>>, vector<32x32xf32>
      %cst_21 = arith.constant dense<0.000000e+00> : vector<32xf32>
      %32 = vector.multi_reduction <add>, %31, %cst_21 [1] : vector<32x32xf32> to vector<32xf32>
      %33 = vector.shape_cast %32 : vector<32xf32> to vector<32x1xf32>
      %cst_22 = arith.constant 3.125000e-02 : f32
      %34 = vector.broadcast %cst_22 : f32 to vector<32x1xf32>
      %35 = arith.mulf %33, %34 : vector<32x1xf32>
      %36 = arith.mulf %31, %31 : vector<32x32xf32>
      %cst_23 = arith.constant dense<0.000000e+00> : vector<32xf32>
      %37 = vector.multi_reduction <add>, %36, %cst_23 [1] : vector<32x32xf32> to vector<32xf32>
      %38 = vector.shape_cast %37 : vector<32xf32> to vector<32x1xf32>
      %cst_24 = arith.constant 3.125000e-02 : f32
      %39 = vector.broadcast %cst_24 : f32 to vector<32x1xf32>
      %40 = arith.mulf %38, %39 : vector<32x1xf32>
      %41 = arith.mulf %35, %35 : vector<32x1xf32>
      %42 = arith.subf %40, %41 : vector<32x1xf32>
      %cst_25 = arith.constant 0.000000e+00 : f32
      %43 = vector.broadcast %cst_25 : f32 to vector<32x1xf32>
      %44 = arith.maximumf %42, %43 : vector<32x1xf32>
      %cst_26 = arith.constant 9.99999974E-6 : f32
      %45 = vector.broadcast %cst_26 : f32 to vector<32x1xf32>
      %46 = arith.addf %44, %45 : vector<32x1xf32>
      %47 = math.rsqrt %46 : vector<32x1xf32>
      %48 = vector.broadcast %35 : vector<32x1xf32> to vector<32x32xf32>
      %49 = arith.subf %31, %48 : vector<32x32xf32>
      %50 = vector.broadcast %47 : vector<32x1xf32> to vector<32x32xf32>
      %51 = arith.mulf %49, %50 : vector<32x32xf32>
      %c0_27 = arith.constant 0 : index
      %c0_28 = arith.constant 0 : index
      %52 = vector.load %arg3[%c0_27, %c0_28] : memref<1x32xf32, #tpu.memory_space<vmem>>, vector<1x32xf32>
      %53 = vector.broadcast %52 : vector<1x32xf32> to vector<32x32xf32>
      %54 = arith.mulf %51, %53 : vector<32x32xf32>
      %c0_29 = arith.constant 0 : index
      %c0_30 = arith.constant 0 : index
      %55 = vector.load %arg4[%c0_29, %c0_30] : memref<1x32xf32, #tpu.memory_space<vmem>>, vector<1x32xf32>
      %56 = vector.broadcast %55 : vector<1x32xf32> to vector<32x32xf32>
      %57 = arith.addf %54, %56 : vector<32x32xf32>
      %58 = tpu.iota {dimensions = array<i32: 0>} : vector<32x1xi32>
      %c16_i32 = arith.constant 16 : i32
      %c0_i32_31 = arith.constant 0 : i32
      %59 = arith.cmpi eq, %c16_i32, %c0_i32_31 : i32
      %c1_i32 = arith.constant 1 : i32
      %60 = arith.select %59, %c1_i32, %c16_i32 : i32
      %61 = vector.broadcast %60 : i32 to vector<32x1xi32>
      %62 = arith.remsi %58, %61 : vector<32x1xi32>
      %c0_i32_32 = arith.constant 0 : i32
      %63 = vector.broadcast %c0_i32_32 : i32 to vector<32x1xi32>
      %64 = arith.cmpi ne, %62, %63 : vector<32x1xi32>
      %c0_i32_33 = arith.constant 0 : i32
      %65 = vector.broadcast %c0_i32_33 : i32 to vector<32x1xi32>
      %66 = arith.cmpi slt, %62, %65 : vector<32x1xi32>
      %c0_i32_34 = arith.constant 0 : i32
      %67 = arith.cmpi slt, %60, %c0_i32_34 : i32
      %68 = vector.broadcast %67 : i1 to vector<32x1xi1>
      %69 = vector.broadcast %68 : vector<32x1xi1> to vector<32x1xi1>
      %70 = arith.xori %66, %69 : vector<32x1xi1>
      %71 = arith.andi %70, %64 : vector<32x1xi1>
      %72 = vector.broadcast %60 : i32 to vector<32x1xi32>
      %73 = arith.addi %62, %72 : vector<32x1xi32>
      %74 = arith.select %71, %73, %62 : vector<32x1xi1>, vector<32x1xi32>
      %c0_i32_35 = arith.constant 0 : i32
      %75 = vector.broadcast %c0_i32_35 : i32 to vector<32x1xi32>
      %76 = arith.cmpi eq, %74, %75 : vector<32x1xi32>
      %c1_i32_36 = arith.constant 1 : i32
      %77 = tpu.dynamic_rotate %57 by %c1_i32_36 dim 0 : vector<32x32xf32>, i32 -> vector<32x32xf32>
      %cst_37 = arith.constant 0.000000e+00 : f32
      %78 = vector.shape_cast %76 : vector<32x1xi1> to vector<32x1xi1>
      %79 = vector.broadcast %78 : vector<32x1xi1> to vector<32x32xi1>
      %80 = vector.broadcast %cst_37 : f32 to vector<32x32xf32>
      %81 = arith.select %79, %80, %77 : vector<32x32xi1>, vector<32x32xf32>
      %c15_i32 = arith.constant 15 : i32
      %82 = vector.broadcast %c15_i32 : i32 to vector<32x1xi32>
      %83 = arith.cmpi eq, %74, %82 : vector<32x1xi32>
      %c31_i32 = arith.constant 31 : i32
      %84 = tpu.dynamic_rotate %57 by %c31_i32 dim 0 : vector<32x32xf32>, i32 -> vector<32x32xf32>
      %cst_38 = arith.constant 0.000000e+00 : f32
      %85 = vector.shape_cast %83 : vector<32x1xi1> to vector<32x1xi1>
      %86 = vector.broadcast %85 : vector<32x1xi1> to vector<32x32xi1>
      %87 = vector.broadcast %cst_38 : f32 to vector<32x32xf32>
      %88 = arith.select %86, %87, %84 : vector<32x32xi1>, vector<32x32xf32>
      %c0_39 = arith.constant 0 : index
      %c0_40 = arith.constant 0 : index
      %89 = vector.load %arg5[%c0_39, %c0_40] : memref<3x32xf32, #tpu.memory_space<vmem>>, vector<1x32xf32>
      %90 = vector.broadcast %89 : vector<1x32xf32> to vector<32x32xf32>
      %91 = arith.mulf %81, %90 : vector<32x32xf32>
      %c1 = arith.constant 1 : index
      %c0_41 = arith.constant 0 : index
      %92 = vector.load %arg5[%c1, %c0_41] : memref<3x32xf32, #tpu.memory_space<vmem>>, vector<1x32xf32>
      %93 = vector.broadcast %92 : vector<1x32xf32> to vector<32x32xf32>
      %94 = arith.mulf %57, %93 : vector<32x32xf32>
      %95 = arith.addf %91, %94 : vector<32x32xf32>
      %c2 = arith.constant 2 : index
      %c0_42 = arith.constant 0 : index
      %96 = vector.load %arg5[%c2, %c0_42] : memref<3x32xf32, #tpu.memory_space<vmem>>, vector<1x32xf32>
      %97 = vector.broadcast %96 : vector<1x32xf32> to vector<32x32xf32>
      %98 = arith.mulf %88, %97 : vector<32x32xf32>
      %99 = arith.addf %95, %98 : vector<32x32xf32>
      %c0_43 = arith.constant 0 : index
      %c0_44 = arith.constant 0 : index
      %100 = vector.load %arg6[%c0_43, %c0_44] : memref<1x32xf32, #tpu.memory_space<vmem>>, vector<1x32xf32>
      %101 = vector.broadcast %100 : vector<1x32xf32> to vector<32x32xf32>
      %102 = arith.addf %99, %101 : vector<32x32xf32>
      %103 = arith.truncf %102 : vector<32x32xf32> to vector<32x32xbf16>
      %c0_45 = arith.constant 0 : index
      %c0_46 = arith.constant 0 : index
      %104 = vector.load %arg12[%c0_45, %c0_46] : memref<32x32xbf16, #tpu.memory_space<vmem>>, vector<32x32xbf16>
      tpu.vector_store %arg12[%c0_45, %c0_46], %103 {strides = array<i32>} : memref<32x32xbf16, #tpu.memory_space<vmem>>, vector<32x32xbf16>,
      %c0_47 = arith.constant 0 : index
      %c0_48 = arith.constant 0 : index
      %105 = vector.load %arg10[%c0_47, %c0_48] : memref<1x32xf32, #tpu.memory_space<vmem>>, vector<1x32xf32>
      %106 = vector.shape_cast %105 : vector<1x32xf32> to vector<1x32xf32>
      %107 = vector.broadcast %106 : vector<1x32xf32> to vector<32x32xf32>
      %c0_49 = arith.constant 0 : index
      %c0_50 = arith.constant 0 : index
      %108 = vector.load %arg13[%c0_49, %c0_50] : memref<32x32xf32, #tpu.memory_space<vmem>>, vector<32x32xf32>
      tpu.vector_store %arg13[%c0_49, %c0_50], %107 {strides = array<i32>} : memref<32x32xf32, #tpu.memory_space<vmem>>, vector<32x32xf32>,
    } else {
    }
    %c0 = arith.constant 0 : index
    %c0_1 = arith.constant 0 : index
    %3 = vector.load %arg12[%c0, %c0_1] : memref<32x32xbf16, #tpu.memory_space<vmem>>, vector<32x32xbf16>
    %c0_2 = arith.constant 0 : index
    %c0_3 = arith.constant 0 : index
    %4 = vector.load %arg7[%c0_2, %c0_3] : memref<32x64xbf16, #tpu.memory_space<vmem>>, vector<32x64xbf16>
    %cst = arith.constant dense<0.000000e+00> : vector<32x64xf32>
    %5 = tpu.matmul %3, %4, %cst {dimension_numbers = #tpu.dot_dimension_numbers<[1], [0], [0], [1], [0, 0, 1, 1], [], []>} : vector<32x32xbf16>, vector<32x64xbf16>, vector<32x64xf32> -> vector<32x64xf32>
    %c0_4 = arith.constant 0 : index
    %c0_5 = arith.constant 0 : index
    %6 = vector.load %arg8[%c0_4, %c0_5] : memref<1x64xf32, #tpu.memory_space<vmem>>, vector<1x64xf32>
    %7 = vector.broadcast %6 : vector<1x64xf32> to vector<32x64xf32>
    %8 = arith.addf %5, %7 : vector<32x64xf32>
    %9 = arith.mulf %8, %8 : vector<32x64xf32>
    %10 = arith.mulf %8, %9 : vector<32x64xf32>
    %cst_6 = arith.constant 4.471500e-02 : f32
    %11 = vector.broadcast %cst_6 : f32 to vector<32x64xf32>
    %12 = arith.mulf %11, %10 : vector<32x64xf32>
    %13 = arith.addf %8, %12 : vector<32x64xf32>
    %cst_7 = arith.constant 0.797884583 : f32
    %14 = vector.broadcast %cst_7 : f32 to vector<32x64xf32>
    %15 = arith.mulf %14, %13 : vector<32x64xf32>
    %16 = math.tanh %15 : vector<32x64xf32>
    %cst_8 = arith.constant 1.000000e+00 : f32
    %17 = vector.broadcast %cst_8 : f32 to vector<32x64xf32>
    %18 = arith.addf %17, %16 : vector<32x64xf32>
    %cst_9 = arith.constant 5.000000e-01 : f32
    %19 = vector.broadcast %cst_9 : f32 to vector<32x64xf32>
    %20 = arith.mulf %19, %18 : vector<32x64xf32>
    %21 = arith.mulf %8, %20 : vector<32x64xf32>
    %c0_10 = arith.constant 0 : index
    %c0_11 = arith.constant 0 : index
    %22 = vector.load %arg13[%c0_10, %c0_11] : memref<32x32xf32, #tpu.memory_space<vmem>>, vector<32x32xf32>
    %23 = arith.truncf %21 : vector<32x64xf32> to vector<32x64xbf16>
    %c0_12 = arith.constant 0 : index
    %c0_13 = arith.constant 0 : index
    %24 = vector.load %arg9[%c0_12, %c0_13] : memref<64x32xbf16, #tpu.memory_space<vmem>>, vector<64x32xbf16>
    %cst_14 = arith.constant dense<0.000000e+00> : vector<32x32xf32>
    %25 = tpu.matmul %23, %24, %cst_14 {dimension_numbers = #tpu.dot_dimension_numbers<[1], [0], [0], [1], [0, 0, 1, 1], [], []>} : vector<32x64xbf16>, vector<64x32xbf16>, vector<32x32xf32> -> vector<32x32xf32>
    %26 = arith.addf %22, %25 : vector<32x32xf32>
    %c0_15 = arith.constant 0 : index
    %c0_16 = arith.constant 0 : index
    %27 = vector.load %arg13[%c0_15, %c0_16] : memref<32x32xf32, #tpu.memory_space<vmem>>, vector<32x32xf32>
    tpu.vector_store %arg13[%c0_15, %c0_16], %26 {strides = array<i32>} : memref<32x32xf32, #tpu.memory_space<vmem>>, vector<32x32xf32>,
    %c0_i32_17 = arith.constant 0 : i32
    %28 = arith.cmpi eq, %arg1, %c0_i32_17 : i32
    %29 = arith.extui %28 : i1 to i32
    %c0_i32_18 = arith.constant 0 : i32
    %30 = arith.cmpi ne, %29, %c0_i32_18 : i32
    scf.if %30 {
      %c0_19 = arith.constant 0 : index
      %c0_20 = arith.constant 0 : index
      %31 = vector.load %arg13[%c0_19, %c0_20] : memref<32x32xf32, #tpu.memory_space<vmem>>, vector<32x32xf32>
      %c0_21 = arith.constant 0 : index
      %c0_22 = arith.constant 0 : index
      %32 = vector.load %arg11[%c0_21, %c0_22] : memref<32x32xf32, #tpu.memory_space<vmem>>, vector<32x32xf32>
      tpu.vector_store %arg11[%c0_21, %c0_22], %31 {strides = array<i32>} : memref<32x32xf32, #tpu.memory_space<vmem>>, vector<32x32xf32>,
    } else {
    }
    return
  }
  func.func @transform_0(%arg0: i32, %arg1: i32) -> (i32, i32) {
    %c0_i32 = arith.constant 0 : i32
    %c0_i32_0 = arith.constant 0 : i32
    return %arg0, %c0_i32 : i32, i32
  }
  func.func @transform_1(%arg0: i32, %arg1: i32) -> (i32, i32) {
    %c0_i32 = arith.constant 0 : i32
    %c0_i32_0 = arith.constant 0 : i32
    %c0_i32_1 = arith.constant 0 : i32
    return %c0_i32, %c0_i32_0 : i32, i32
  }
  func.func @transform_2(%arg0: i32, %arg1: i32) -> (i32, i32) {
    %c0_i32 = arith.constant 0 : i32
    %c0_i32_0 = arith.constant 0 : i32
    %c0_i32_1 = arith.constant 0 : i32
    return %c0_i32, %c0_i32_0 : i32, i32
  }
  func.func @transform_3(%arg0: i32, %arg1: i32) -> (i32, i32) {
    %c0_i32 = arith.constant 0 : i32
    %c0_i32_0 = arith.constant 0 : i32
    %c0_i32_1 = arith.constant 0 : i32
    return %c0_i32, %c0_i32_0 : i32, i32
  }
  func.func @transform_4(%arg0: i32, %arg1: i32) -> (i32, i32) {
    %c0_i32 = arith.constant 0 : i32
    %c0_i32_0 = arith.constant 0 : i32
    %c0_i32_1 = arith.constant 0 : i32
    return %c0_i32, %c0_i32_0 : i32, i32
  }
  func.func @transform_5(%arg0: i32, %arg1: i32) -> (i32, i32) {
    %c0_i32 = arith.constant 0 : i32
    %c0_i32_0 = arith.constant 0 : i32
    %c0_i32_1 = arith.constant 0 : i32
    return %c0_i32, %c0_i32_0 : i32, i32
  }
  func.func @transform_6(%arg0: i32, %arg1: i32) -> (i32, i32) {
    %c0_i32 = arith.constant 0 : i32
    %c0_i32_0 = arith.constant 0 : i32
    %c0_i32_1 = arith.constant 0 : i32
    return %c0_i32, %c0_i32_0 : i32, i32
  }
  func.func @transform_7(%arg0: i32, %arg1: i32) -> (i32, i32) {
    %c0_i32 = arith.constant 0 : i32
    %c0_i32_0 = arith.constant 0 : i32
    %c0_i32_1 = arith.constant 0 : i32
    return %c0_i32, %c0_i32_0 : i32, i32
  }
  func.func @transform_8(%arg0: i32, %arg1: i32) -> (i32, i32) {
    %c0_i32 = arith.constant 0 : i32
    %c0_i32_0 = arith.constant 0 : i32
    %c0_i32_1 = arith.constant 0 : i32
    return %c0_i32, %c0_i32_0 : i32, i32
  }
  func.func @transform_9(%arg0: i32, %arg1: i32) -> (i32, i32) {
    %c0_i32 = arith.constant 0 : i32
    %c0_i32_0 = arith.constant 0 : i32
    return %arg0, %c0_i32 : i32, i32
  }
}

</mosaic_0001>

<bundles_post_ra>
// kernel: tpu_custom_call.1
= control target key start
LH: loop header
LB: loop body
LE: loop exit
PB: predicated region body
PF: predicated region fallthrough
CT: control target
= control target key end

     0   :  { %14 = vsyncpa [#allocation5], 0  ;;  %s933_s0 = inlined_call_operand.vmem [shape: f32[32,32], index: 0, kind: input, shape index: {}]   ;;  %s934_s1 = inlined_call_operand.hbm [shape: f32[1,32], index: 1, kind: input, shape index: {}]   ;;  %s935_s2 = inlined_call_operand.vmem [shape: f32[1,32], index: 2, kind: input, shape index: {}]   ;;  %s936_s3 = inlined_call_operand.hbm [shape: f32[3,32], index: 3, kind: input, shape index: {}]   ;;  %s937_s4 = inlined_call_operand.vmem [shape: f32[1,32], index: 4, kind: input, shape index: {}]   ;;  %s938_s5 = inlined_call_operand.vmem [shape: bf16[32,64], index: 5, kind: input, shape index: {}]   ;;  %s939_s6 = inlined_call_operand.vmem [shape: f32[1,64], index: 6, kind: input, shape index: {}]   ;;  %s940_s7 = inlined_call_operand.vmem [shape: bf16[64,32], index: 7, kind: input, shape index: {}]   ;;  %s941_s8 = inlined_call_operand.vmem [shape: f32[1,32], index: 8, kind: input, shape index: {}]   ;;  %s942_s9 = inlined_call_operand.hbm [shape: f32[32,32], index: 9, kind: output, shape index: {}]  }
   0x1   :  { %15 = vsyncpa [#allocation8], 0 }
   0x2   :  { %16 = vsyncpa [#allocation6], 0  ;;  %s24_s11 = sshll.u32 %s934_s1, 4  ;;  %s697_s12 = smov [#allocation4]   ;;  %s25_s11 = int_to_ptr.hbm [resolvable:$true] %s24_s11 }
   0x3   :  { %s26_s13 = sshll.u32 %s697_s12, 4  ;;  %s37_s16 = sshll.u32 %s936_s3, 4  ;;  %s27_s13 = int_to_ptr.vmem [resolvable:$true] %s26_s13  ;;  %s38_s16 = int_to_ptr.hbm [resolvable:$true] %s37_s16 }
   0x4   :  { %29 = dma.hbm_to_vmem [thread:$0]  %s25_s11, 16, %s27_s13, [#allocation5]  }
   0x5   :  { %s698_s17 = smov [#allocation7]  }
   0x6   :  { %s39_s18 = sshll.u32 %s698_s17, 4  ;;  %s40_s18 = int_to_ptr.vmem [resolvable:$true] %s39_s18 }
   0x7   :  { %42 = dma.hbm_to_vmem [thread:$0]  %s38_s16, 64, %s40_s18, [#allocation8]  }
   0x8   :  { %691 = dma.done.wait [#allocation5], 16  }
   0x9   :  { %692 = vsyncadd [#allocation5], 4294967280 }
   0xa   :  { %693 = dma.done.wait [#allocation8], 64  }
   0xb   :  { %694 = vsyncadd [#allocation8], 4294967232  ;;  %vm70_vm0 = vcmask 261120   ;;  %v761_v0 = vld [vmem:[%s933_s0 + $0x18] sm:$0xff]  ;;  %v766_v1 = vld [vmem:[%s933_s0 + $0x8] sm:$0xff]  ;;  %v187_v55 = vlaneseq  ;;  %s526_s20 = sshll.u32 %s942_s9, 4  ;;  %s527_s20 = int_to_ptr.hbm [resolvable:$true] %s526_s20 }
   0xc   :  { %v80_v2 = vsel %vm70_vm0, %v761_v0, 0.0  ;;  %v74_v3 = vsel %vm70_vm0, %v766_v1, 0.0  ;;  %v88_v4 = vmul.f32 %v766_v1, %v766_v1  ;;  %v777_v5 = vld [vmem:[%s933_s0 + $0x10] sm:$0xff]  ;;  %v783_v7 = vld [vmem:[%s933_s0] sm:$0xff]  ;;  %v90_v12 = vmul.f32 %v761_v0, %v761_v0  ;;  %s700_s21 = smov 128   ;;  %s701_s3 = smov 8  }
   0xd   :  { %81 = vadd.xlane.f32.xlu1 %v80_v2  ;;  %75 = vadd.xlane.f32.xlu0 %v74_v3  ;;  %v89_v8 = vmul.f32 %v777_v5, %v777_v5  ;;  %v77_v9 = vsel %vm70_vm0, %v777_v5, 0.0  ;;  %v71_v10 = vsel %vm70_vm0, %v783_v7, 0.0  ;;  %v87_v13 = vmul.f32 %v783_v7, %v783_v7  ;;  %v814_v61 = vld [vmem:[#allocation4] ss:$0 sm:$0xff] }
   0xe   :  { %v94_v6 = vsel %vm70_vm0, %v88_v4, 0.0  ;;  %v100_v14 = vsel %vm70_vm0, %v90_v12, 0.0  ;;  %v816_v63 = vshrl.u32 %v187_v55, 7 }
   0xf   :  { %95 = vadd.xlane.f32.xlu2 %v94_v6  ;;  %v97_v11 = vsel %vm70_vm0, %v89_v8, 0.0  ;;  %v91_v15 = vsel %vm70_vm0, %v87_v13, 0.0 }
  0x10   :  { %v190_v12 = vadd.s32 16, %v816_v63  ;;  %vm248_vm10 = vcmp.lt.s32.totalorder %v816_v63, 1  ;;  %vm273_vm14 = vcmp.lt.s32.totalorder %v816_v63, 7 }
  0x15   :  { %78 = vadd.xlane.f32.xlu0 %v77_v9  ;;  %72 = vadd.xlane.f32.xlu1 %v71_v10  ;;  %v579_v10 = vld [vmem:[%s938_s5 + $0x8] sm:$0xff] }
  0x16   :  { %584 = vmatpush.bf16.msra.mxu3 %v579_v10  ;;  %388 = vmatpush.bf16.msra.mxu0 %v579_v10 }
  0x17   :  { %98 = vadd.xlane.f32.xlu2 %v97_v11 }
  0x1d   :  { %101 = vadd.xlane.f32.xlu0 %v100_v14  ;;  %92 = vadd.xlane.f32.xlu1 %v91_v15 }
  0x80   :  { %v82_v16 = vpop.xlane.xlu1 %81  ;;  %v76_v17 = vpop.xlane.xlu0 %75 }
  0x81   :  { %v84_v18 = vmul.f32 0.03125, %v76_v17  ;;  %v802_v31 = vmul.f32 0.03125, %v82_v16  ;;  %v578_v17 = vld [vmem:[%s938_s5] sm:$0xff] }
  0x82   :  { %v96_v19 = vpop.xlane.xlu2 %95  ;;  %585 = vmatpush.bf16.msra.mxu3 %v578_v17  ;;  %389 = vmatpush.bf16.msra.mxu0 %v578_v17 }
  0x83   :  { %v108_v20 = vmul.f32 %v84_v18, %v84_v18  ;;  %v104_v21 = vmul.f32 0.03125, %v96_v19  ;;  %v110_v40 = vmul.f32 %v802_v31, %v802_v31  ;;  %v164_v58 = vsub.f32 %v766_v1, %v84_v18  ;;  %v596_v1 = vld [vmem:[%s935_s2] ss:$0 sm:$0xff] }
  0x84   :  { %v189_v18 = vadd.s32 8, %v816_v63 }
  0x85   :  { %v112_v22 = vsub.f32 %v104_v21, %v108_v20 }
  0x87   :  { %v116_v23 = vmax.f32 %v112_v22, 0.0 }
  0x88   :  { %v79_v24 = vpop.xlane.xlu0 %78  ;;  %v73_v25 = vpop.xlane.xlu1 %72 }
  0x89   :  { %v798_v26 = vmul.f32 0.03125, %v79_v24  ;;  %v120_v27 = vadd.f32 1e-05, %v116_v23  ;;  %v804_v32 = vmul.f32 0.03125, %v73_v25  ;;  %v210_v24 = vand.u32 15, %v190_v12 }
  0x8a   :  { %v99_v28 = vpop.xlane.xlu2 %98 }
  0x8b   :  { %v109_v29 = vmul.f32 %v798_v26, %v798_v26  ;;  %603 = vrsqrt.f32 %v120_v27  ;;  %v105_v30 = vmul.f32 0.03125, %v99_v28  ;;  %v107_v41 = vmul.f32 %v804_v32, %v804_v32 }
  0x8c   :  { %vm139_vm2 = vweird.f32 %v120_v27  ;;  %v165_v14 = vsub.f32 %v777_v5, %v798_v26  ;;  %v203_v28 = vand.u32 15, %v189_v18  ;;  %vm843_vm13 = vcmp.eq.s32.totalorder %v210_v24, 0 }
  0x8d   :  { %v113_v33 = vsub.f32 %v105_v30, %v109_v29  ;;  %v191_v29 = vadd.s32 24, %v816_v63 }
  0x8f   :  { %v117_v36 = vmax.f32 %v113_v33, 0.0 }
  0x90   :  { %v102_v34 = vpop.xlane.xlu0 %101  ;;  %v93_v35 = vpop.xlane.xlu1 %92 }
  0x91   :  { %v106_v37 = vmul.f32 0.03125, %v102_v34  ;;  %v103_v38 = vmul.f32 0.03125, %v93_v35  ;;  %v604_v39 = vpop.eup %603  ;;  %v121_v43 = vadd.f32 1e-05, %v117_v36  ;;  %v163_v35 = vsub.f32 %v783_v7, %v804_v32 }
  0x92   :  { %v134_v42 = vmul.f32 %v604_v39, %v120_v27  ;;  %vm140_vm1 = vweird.f32 %v604_v39  ;;  %v166_v27 = vsub.f32 %v761_v0, %v802_v31  ;;  %v196_v7 = vand.u32 15, %v816_v63 }
  0x93   :  { %v114_v44 = vsub.f32 %v106_v37, %v110_v40  ;;  %v111_v45 = vsub.f32 %v103_v38, %v107_v41  ;;  %605 = vrsqrt.f32 %v121_v43  ;;  %vm141_vm3 = vmor %vm139_vm2, %vm140_vm1  ;;  %vm149_vm5 = vweird.f32 %v121_v43  ;;  %v598_v37 = vld [vmem:[#allocation7] ss:$0 sm:$0xff] }
  0x94   :  { %v135_v46 = vmul.f32 %v604_v39, %v134_v42  ;;  %vm853_vm1 = vcmp.eq.s32.totalorder %v203_v28, 15  ;;  %vm864_vm2 = vcmp.eq.s32.totalorder %v196_v7, 0 }
  0x95   :  { %v118_v47 = vmax.f32 %v114_v44, 0.0  ;;  %v115_v48 = vmax.f32 %v111_v45, 0.0 }
  0x96   :  { %v136_v49 = vmul.f32 0.5, %v135_v46  ;;  %v217_v46 = vand.u32 15, %v191_v29 }
  0x97   :  { %v122_v50 = vadd.f32 1e-05, %v118_v47  ;;  %v810_v51 = vadd.f32 1e-05, %v115_v48 }
  0x98   :  { %v137_v52 = vsub.f32 1.5, %v136_v49 }
  0x99   :  { %607 = vrsqrt.f32 %v122_v50  ;;  %v606_v53 = vpop.eup %605  ;;  %vm159_vm8 = vweird.f32 %v122_v50  ;;  %vm129_vm12 = vweird.f32 %v810_v51 }
  0x9a   :  { %v138_v54 = vmul.f32 %v604_v39, %v137_v52  ;;  %609 = vrsqrt.f32 %v810_v51  ;;  %v144_v56 = vmul.f32 %v606_v53, %v121_v43  ;;  %vm150_vm4 = vweird.f32 %v606_v53  ;;  %v597_v43 = vld [vmem:[#allocation7 + $0x1] ss:$0 sm:$0xff] }
  0x9b   :  { %vm151_vm6 = vmor %vm149_vm5, %vm150_vm4  ;;  %vm328_vm4 = vcmask 257024   ;;  %vm475_vm5 = vcmask 523264  }
  0x9c   :  { %v142_v57 = vsel %vm141_vm3, %v604_v39, %v138_v54  ;;  %v145_v59 = vmul.f32 %v606_v53, %v144_v56  ;;  %vm871_vm3 = vcmp.eq.s32.totalorder %v217_v46, 15 }
  0x9d   :  { %v168_v62 = vmul.f32 %v164_v58, %v142_v57  ;;  %v599_v57 = vld [vmem:[#allocation7 + $0x2] ss:$0 sm:$0xff] }
  0x9e   :  { %v146_v2 = vmul.f32 0.5, %v145_v59 }
  0x9f   :  { %v608_v60 = vpop.eup %607  ;;  %v176_v11 = vmul.f32 %v814_v61, %v168_v62 }
  0xa0   :  { %v610_v3 = vpop.eup %609  ;;  %v154_v4 = vmul.f32 %v608_v60, %v122_v50  ;;  %v147_v6 = vsub.f32 1.5, %v146_v2  ;;  %vm160_vm7 = vweird.f32 %v608_v60 }
  0xa1   :  { %v124_v8 = vmul.f32 %v610_v3, %v810_v51  ;;  %v833_v23 = vadd.f32 %v596_v1, %v176_v11  ;;  %vm130_vm9 = vweird.f32 %v610_v3  ;;  %vm161_vm11 = vmor %vm159_vm8, %vm160_vm7 }
  0xa2   :  { %v155_v9 = vmul.f32 %v608_v60, %v154_v4  ;;  %v148_v13 = vmul.f32 %v606_v53, %v147_v6  ;;  %vm131_vm15 = vmor %vm129_vm12, %vm130_vm9  ;;  %v600_v6 = vld [vmem:[%s937_s4] ss:$0 sm:$0xff] }
  0xa3   :  { %v125_v16 = vmul.f32 %v610_v3, %v124_v8  ;;  %v245_v31 = vrot.slane %v833_v23, 7  ;;  %v270_v41 = vrot.slane %v833_v23, 1  ;;  %v299_v56 = vmul.f32 %v597_v43, %v833_v23 }
  0xa4   :  { %v156_v15 = vmul.f32 0.5, %v155_v9  ;;  %v152_v19 = vsel %vm151_vm6, %v606_v53, %v148_v13 }
  0xa5   :  { %v169_v20 = vmul.f32 %v165_v14, %v152_v19  ;;  %v126_v22 = vmul.f32 0.5, %v125_v16 }
  0xa6   :  { %v157_v21 = vsub.f32 1.5, %v156_v15 }
  0xa7   :  { %v177_v5 = vmul.f32 %v814_v61, %v169_v20  ;;  %v127_v26 = vsub.f32 1.5, %v126_v22 }
  0xa8   :  { %v158_v25 = vmul.f32 %v608_v60, %v157_v21 }
  0xa9   :  { %v185_v30 = vadd.f32 %v596_v1, %v177_v5  ;;  %v128_v34 = vmul.f32 %v610_v3, %v127_v26 }
  0xaa   :  { %v162_v33 = vsel %vm161_vm11, %v608_v60, %v158_v25 }
  0xab   :  { %v170_v0 = vmul.f32 %v166_v27, %v162_v33  ;;  %v246_v38 = vrot.slane %v185_v30, 7  ;;  %v271_v39 = vrot.slane %v185_v30, 1  ;;  %v132_v40 = vsel %vm131_vm15, %v610_v3, %v128_v34 }
  0xac   :  { %v167_v32 = vmul.f32 %v163_v35, %v132_v40  ;;  %v300_v59 = vmul.f32 %v597_v43, %v185_v30  ;;  %v601_v40 = vld [vmem:[%s939_s6] ss:$0 sm:$0xff]  ;;  %s699_s6 = smov [#allocation9]  }
  0xad   :  { %v178_v42 = vmul.f32 %v814_v61, %v170_v0  ;;  %v250_v45 = vsel %vm248_vm10, %v245_v31, %v246_v38  ;;  %v275_v48 = vsel %vm273_vm14, %v270_v41, %v271_v39 }
  0xae   :  { %v263_v47 = vsel %vm843_vm13, 0.0, %v250_v45  ;;  %v175_v50 = vmul.f32 %v814_v61, %v167_v32  ;;  %v287_v58 = vsel %vm853_vm1, 0.0, %v275_v48  ;;  %v602_v48 = vld [vmem:[%s941_s8] ss:$0 sm:$0xff] }
  0xaf   :  { %v186_v49 = vadd.f32 %v596_v1, %v178_v42  ;;  %v294_v51 = vmul.f32 %v598_v37, %v263_v47  ;;  %v309_v22 = vmul.f32 %v599_v57, %v287_v58  ;;  %337 = vst.msk [vmem:[#allocation3] sm:$0xff] %vm70_vm0, %v602_v48 }
  0xb0   :  { %v183_v55 = vadd.f32 %v596_v1, %v175_v50  ;;  %338 = vst.msk [vmem:[#allocation3 + $0x8] sm:$0xff] %vm70_vm0, %v602_v48 }
  0xb1   :  { %v247_v52 = vrot.slane %v186_v49, 7  ;;  %v272_v53 = vrot.slane %v186_v49, 1  ;;  %v304_v4 = vadd.f32 %v300_v59, %v294_v51  ;;  %v301_v9 = vmul.f32 %v597_v43, %v186_v49  ;;  %339 = vst.msk [vmem:[#allocation3 + $0x10] sm:$0xff] %vm70_vm0, %v602_v48 }
  0xb2   :  { %v244_v2 = vrot.slane %v183_v55, 7  ;;  %v269_v3 = vrot.slane %v183_v55, 1  ;;  %v298_v20 = vmul.f32 %v597_v43, %v183_v55  ;;  %340 = vst.msk [vmem:[#allocation3 + $0x18] sm:$0xff] %vm70_vm0, %v602_v48 }
  0xb3   :  { %v249_v61 = vsel %vm248_vm10, %v246_v38, %v247_v52  ;;  %v274_v62 = vsel %vm273_vm14, %v271_v39, %v272_v53  ;;  %v582_v38 = vld [vmem:[%s940_s7 + $0x10] sm:$0xff]  ;;  %v581_v39 = vld [vmem:[%s940_s7 + $0x8] sm:$0xff] }
  0xb4   :  { %v295_v8 = vmul.f32 %v598_v37, %v249_v61  ;;  %v310_v10 = vmul.f32 %v599_v57, %v274_v62  ;;  %v251_v1 = vsel %vm248_vm10, %v244_v2, %v245_v31  ;;  %v252_v11 = vsel %vm248_vm10, %v247_v52, %v244_v2 }
  0xb5   :  { %v276_v12 = vsel %vm273_vm14, %v269_v3, %v270_v41  ;;  %v277_v13 = vsel %vm273_vm14, %v272_v53, %v269_v3  ;;  %v261_v16 = vsel %vm864_vm2, 0.0, %v252_v11  ;;  %v293_v19 = vmul.f32 %v598_v37, %v251_v1  ;;  %v580_v41 = vld [vmem:[%s940_s7] sm:$0xff] }
  0xb6   :  { %v305_v14 = vadd.f32 %v301_v9, %v295_v8  ;;  %v314_v15 = vadd.f32 %v310_v10, %v304_v4  ;;  %v289_v17 = vsel %vm871_vm3, 0.0, %v277_v13  ;;  %v292_v18 = vmul.f32 %v598_v37, %v261_v16  ;;  %v583_v37 = vld [vmem:[%s940_s7 + $0x18] sm:$0xff]  ;;  %s524_s7 = sshll.u32 %s699_s6, 4  ;;  %s525_s7 = int_to_ptr.vmem [resolvable:$true] %s524_s7 }
  0xb7   :  { %v311_v21 = vmul.f32 %v599_v57, %v289_v17  ;;  %v303_v5 = vadd.f32 %v299_v56, %v293_v19  ;;  %v308_v25 = vmul.f32 %v599_v57, %v276_v12  ;;  %486 = vmatpush.bf16.msra.mxu1 %v583_v37  ;;  %586 = vmatpush.bf16.msra.mxu2 %v583_v37 }
  0xb8   :  { %v322_v23 = vadd.f32 %v600_v6, %v314_v15  ;;  %v302_v24 = vadd.f32 %v298_v20, %v292_v18 }
  0xb9   :  { %v315_v63 = vadd.f32 %v311_v21, %v305_v14  ;;  %v313_v28 = vadd.f32 %v309_v22, %v303_v5 }
  0xba   :  { %v326_v26 = vpack.c.bf16 %v322_v23, %v322_v23  ;;  %v312_v27 = vadd.f32 %v308_v25, %v302_v24 }
  0xbb   :  { %v323_v29 = vadd.f32 %v600_v6, %v315_v63  ;;  %v321_v33 = vadd.f32 %v600_v6, %v313_v28  ;;  %487 = vmatpush.bf16.msra.mxu1 %v582_v38  ;;  %587 = vmatpush.bf16.msra.mxu2 %v582_v38  ;;  %v437_v63 = vld [vmem:[#allocation3] sm:$0xff]  ;;  %v438_v28 = vld [vmem:[#allocation3 + $0x8] sm:$0xff] }
  0xbc   :  { %331 = vst.msk [vmem:[#allocation2 + $0x8] sm:$0xf] %vm328_vm4, %v326_v26  ;;  %v320_v30 = vadd.f32 %v600_v6, %v312_v27 }
  0xbd   :  { %v327_v34 = vpack.c.bf16 %v323_v29, %v323_v29  ;;  %v325_v36 = vpack.c.bf16 %v321_v33, %v321_v33  ;;  %v439_v29 = vld [vmem:[#allocation3 + $0x10] sm:$0xff] }
  0xbe   :  { %v324_v35 = vpack.c.bf16 %v320_v30, %v320_v30 }
  0xbf   :  { %332 = vst.msk [vmem:[#allocation2 + $0xc] sm:$0xf] %vm328_vm4, %v327_v34  ;;  %488 = vmatpush.bf16.msra.mxu1 %v581_v39  ;;  %588 = vmatpush.bf16.msra.mxu2 %v581_v39 }
  0xc0   :  { %329 = vst.msk [vmem:[#allocation2] sm:$0xf] %vm328_vm4, %v324_v35 }
  0xc1   :  { %330 = vst.msk [vmem:[#allocation2 + $0x4] sm:$0xf] %vm328_vm4, %v325_v36 }
  0xc3   :  { %489 = vmatpush.bf16.msra.mxu1 %v580_v41  ;;  %589 = vmatpush.bf16.msra.mxu2 %v580_v41 }
  0xc6   :  { %v577_v0 = vld [vmem:[#allocation2 + $0x8] sm:$0xff] }
  0xc7   :  { %557 = vmatmul.msk.bf16.vlgmr.msra.gmra.mxu3 %vm70_vm0, %v577_v0  ;;  %v440_v0 = vld [vmem:[#allocation3 + $0x18] sm:$0xff] }
  0xc8   :  { %v576_v31 = vld [vmem:[#allocation2] sm:$0xff] }
  0xc9   :  { %556 = vmatmul.msk.bf16.vlgmr.msra.gmra.mxu0 %vm70_vm0, %v576_v31 }
 0x146   :  { %v391_v42 = vpop.f32.mrf.mxu0 }
 0x147   :  { %v392_v7 = vadd.f32 %v601_v40, %v391_v42 }
 0x149   :  { %v401_v32 = vmul.f32 %v392_v7, %v392_v7 }
 0x14a   :  { %v396_v43 = vpop.f32.mrf.mxu3 }
 0x14b   :  { %v397_v44 = vadd.f32 %v601_v40, %v396_v43  ;;  %v405_v45 = vmul.f32 %v401_v32, %v392_v7 }
 0x14d   :  { %v403_v46 = vmul.f32 %v397_v44, %v397_v44  ;;  %v409_v47 = vmul.f32 0.044715, %v405_v45 }
 0x14e   :  { %v393_v50 = vpop.f32.mrf.mxu0 }
 0x14f   :  { %v407_v49 = vmul.f32 %v403_v46, %v397_v44  ;;  %v413_v51 = vadd.f32 %v409_v47, %v392_v7  ;;  %v394_v52 = vadd.f32 %v601_v40, %v393_v50 }
 0x151   :  { %v411_v53 = vmul.f32 0.044715, %v407_v49  ;;  %v417_v54 = vmul.f32 0.7978846, %v413_v51  ;;  %v402_v55 = vmul.f32 %v394_v52, %v394_v52 }
 0x152   :  { %v398_v56 = vpop.f32.mrf.mxu3 }
 0x153   :  { %v415_v57 = vadd.f32 %v411_v53, %v397_v44  ;;  %v399_v58 = vadd.f32 %v601_v40, %v398_v56  ;;  %v406_v59 = vmul.f32 %v402_v55, %v394_v52  ;;  %611 = vtanh.f32 %v417_v54 }
 0x155   :  { %v419_v60 = vmul.f32 0.7978846, %v415_v57  ;;  %v404_v61 = vmul.f32 %v399_v58, %v399_v58  ;;  %v410_v62 = vmul.f32 0.044715, %v406_v59 }
 0x157   :  { %v408_v2 = vmul.f32 %v404_v61, %v399_v58  ;;  %v414_v3 = vadd.f32 %v410_v62, %v394_v52  ;;  %613 = vtanh.f32 %v419_v60 }
 0x159   :  { %v412_v4 = vmul.f32 0.044715, %v408_v2  ;;  %v418_v6 = vmul.f32 0.7978846, %v414_v3  ;;  %v612_v9 = vpop.eup %611 }
 0x15a   :  { %v425_v11 = vadd.f32 1.0, %v612_v9 }
 0x15b   :  { %v416_v8 = vadd.f32 %v412_v4, %v399_v58  ;;  %615 = vtanh.f32 %v418_v6 }
 0x15c   :  { %v429_v15 = vmul.f32 0.5, %v425_v11 }
 0x15d   :  { %v420_v10 = vmul.f32 0.7978846, %v416_v8  ;;  %v614_v1 = vpop.eup %613 }
 0x15e   :  { %v427_v13 = vadd.f32 1.0, %v614_v1  ;;  %v433_v20 = vmul.f32 %v429_v15, %v392_v7 }
 0x15f   :  { %617 = vtanh.f32 %v420_v10 }
 0x160   :  { %v431_v19 = vmul.f32 0.5, %v427_v13 }
 0x161   :  { %v616_v12 = vpop.eup %615 }
 0x162   :  { %v426_v14 = vadd.f32 1.0, %v616_v12  ;;  %v435_v24 = vmul.f32 %v431_v19, %v397_v44 }
 0x164   :  { %v430_v17 = vmul.f32 0.5, %v426_v14 }
 0x165   :  { %v618_v16 = vpop.eup %617 }
 0x166   :  { %v428_v18 = vadd.f32 1.0, %v618_v16  ;;  %v434_v21 = vmul.f32 %v430_v17, %v394_v52 }
 0x168   :  { %v432_v22 = vmul.f32 0.5, %v428_v18  ;;  %v441_v23 = vpack.c.bf16 %v434_v21, %v433_v20 }
 0x16a   :  { %v436_v5 = vmul.f32 %v432_v22, %v399_v58  ;;  %574 = vmatmul.msk.bf16.vlgmr.msra.gmra.mxu1 %vm475_vm5, %v441_v23 }
 0x16c   :  { %v442_v25 = vpack.c.bf16 %v436_v5, %v435_v24 }
 0x16e   :  { %575 = vmatmul.msk.bf16.vlgmr.msra.gmra.mxu2 %vm475_vm5, %v442_v25 }
 0x1e7   :  { %v491_v26 = vpop.f32.mrf.mxu1 }
 0x1e8   :  { %v501_v27 = vadd.f32 %v491_v26, %v437_v63 }
 0x1ea   :  { %505 = vst.msk [vmem:[#allocation3] sm:$0xff] %vm70_vm0, %v501_v27 }
 0x1ef   :  { %v493_v30 = vpop.f32.mrf.mxu1 }
 0x1f0   :  { %v502_v33 = vadd.f32 %v493_v30, %v438_v28 }
 0x1f1   :  { %v496_v34 = vpop.f32.mrf.mxu2  ;;  %v512_v36 = vld [vmem:[#allocation3] sm:$0xff] }
 0x1f2   :  { %v503_v35 = vadd.f32 %v496_v34, %v439_v29  ;;  %506 = vst.msk [vmem:[#allocation3 + $0x8] sm:$0xff] %vm70_vm0, %v502_v33 }
 0x1f3   :  { %516 = vst.msk [vmem:[#allocation9] sm:$0xff] %vm70_vm0, %v512_v36 }
 0x1f4   :  { %507 = vst.msk [vmem:[#allocation3 + $0x10] sm:$0xff] %vm70_vm0, %v503_v35 }
 0x1f9   :  { %v498_v31 = vpop.f32.mrf.mxu2  ;;  %v513_v38 = vld [vmem:[#allocation3 + $0x8] sm:$0xff] }
 0x1fa   :  { %v504_v37 = vadd.f32 %v498_v31, %v440_v0  ;;  %517 = vst.msk [vmem:[#allocation9 + $0x8] sm:$0xff] %vm70_vm0, %v513_v38 }
 0x1fb   :  { %v514_v39 = vld [vmem:[#allocation3 + $0x10] sm:$0xff] }
 0x1fc   :  { %508 = vst.msk [vmem:[#allocation3 + $0x18] sm:$0xff] %vm70_vm0, %v504_v37 }
 0x1fd   :  { %518 = vst.msk [vmem:[#allocation9 + $0x10] sm:$0xff] %vm70_vm0, %v514_v39 }
 0x203   :  { %v515_v40 = vld [vmem:[#allocation3 + $0x18] sm:$0xff] }
 0x204   :  { %519 = vst.msk [vmem:[#allocation9 + $0x18] sm:$0xff] %vm70_vm0, %v515_v40 }
 0x205   :  { %532 = dma.vmem_to_hbm [thread:$0]  %s525_s7, 512, %s527_s20, [#allocation6], %s700_s21, %s700_s21, %s701_s3  }
 0x206   :  { %695 = dma.done.wait [#allocation6], 512  }
 0x207   :  { %696 = vsyncadd [#allocation6], 4294966784 }
 0x208   :  { %537 = vsyncpa [#allocation5], 1 }
 0x209   :  { %538 = vsyncpa [#allocation8], 1 }
 0x20a   :  { %539 = vsyncpa [#allocation6], 1 }

// kernel: tpu_custom_call.1
= control target key start
LH: loop header
LB: loop body
LE: loop exit
PB: predicated region body
PF: predicated region fallthrough
CT: control target
= control target key end

     0   :  { %14 = vsyncpa [#allocation5], 0  ;;  %s933_s0 = inlined_call_operand.vmem [shape: f32[32,32], index: 0, kind: input, shape index: {}]   ;;  %s934_s1 = inlined_call_operand.hbm [shape: f32[1,32], index: 1, kind: input, shape index: {}]   ;;  %s935_s2 = inlined_call_operand.vmem [shape: f32[1,32], index: 2, kind: input, shape index: {}]   ;;  %s936_s3 = inlined_call_operand.hbm [shape: f32[3,32], index: 3, kind: input, shape index: {}]   ;;  %s937_s4 = inlined_call_operand.vmem [shape: f32[1,32], index: 4, kind: input, shape index: {}]   ;;  %s938_s5 = inlined_call_operand.vmem [shape: bf16[32,64], index: 5, kind: input, shape index: {}]   ;;  %s939_s6 = inlined_call_operand.vmem [shape: f32[1,64], index: 6, kind: input, shape index: {}]   ;;  %s940_s7 = inlined_call_operand.vmem [shape: bf16[64,32], index: 7, kind: input, shape index: {}]   ;;  %s941_s8 = inlined_call_operand.vmem [shape: f32[1,32], index: 8, kind: input, shape index: {}]   ;;  %s942_s9 = inlined_call_operand.hbm [shape: f32[32,32], index: 9, kind: output, shape index: {}]  }
   0x1   :  { %15 = vsyncpa [#allocation8], 0 }
   0x2   :  { %16 = vsyncpa [#allocation6], 0  ;;  %s24_s11 = sshll.u32 %s934_s1, 4  ;;  %s697_s12 = smov [#allocation4]   ;;  %s25_s11 = int_to_ptr.hbm [resolvable:$true] %s24_s11 }
   0x3   :  { %s26_s13 = sshll.u32 %s697_s12, 4  ;;  %s37_s16 = sshll.u32 %s936_s3, 4  ;;  %s27_s13 = int_to_ptr.vmem [resolvable:$true] %s26_s13  ;;  %s38_s16 = int_to_ptr.hbm [resolvable:$true] %s37_s16 }
   0x4   :  { %29 = dma.hbm_to_vmem [thread:$0]  %s25_s11, 16, %s27_s13, [#allocation5]  }
   0x5   :  { %s698_s17 = smov [#allocation7]  }
   0x6   :  { %s39_s18 = sshll.u32 %s698_s17, 4  ;;  %s40_s18 = int_to_ptr.vmem [resolvable:$true] %s39_s18 }
   0x7   :  { %42 = dma.hbm_to_vmem [thread:$0]  %s38_s16, 64, %s40_s18, [#allocation8]  }
   0x8   :  { %691 = dma.done.wait [#allocation5], 16  }
   0x9   :  { %692 = vsyncadd [#allocation5], 4294967280 }
   0xa   :  { %693 = dma.done.wait [#allocation8], 64  }
   0xb   :  { %694 = vsyncadd [#allocation8], 4294967232  ;;  %vm70_vm0 = vcmask 261120   ;;  %v761_v0 = vld [vmem:[%s933_s0 + $0x18] sm:$0xff]  ;;  %v766_v1 = vld [vmem:[%s933_s0 + $0x8] sm:$0xff]  ;;  %v187_v55 = vlaneseq  ;;  %s526_s20 = sshll.u32 %s942_s9, 4  ;;  %s527_s20 = int_to_ptr.hbm [resolvable:$true] %s526_s20 }
   0xc   :  { %v80_v2 = vsel %vm70_vm0, %v761_v0, 0.0  ;;  %v74_v3 = vsel %vm70_vm0, %v766_v1, 0.0  ;;  %v88_v4 = vmul.f32 %v766_v1, %v766_v1  ;;  %v777_v5 = vld [vmem:[%s933_s0 + $0x10] sm:$0xff]  ;;  %v783_v7 = vld [vmem:[%s933_s0] sm:$0xff]  ;;  %v90_v12 = vmul.f32 %v761_v0, %v761_v0  ;;  %s700_s21 = smov 128   ;;  %s701_s3 = smov 8  }
   0xd   :  { %81 = vadd.xlane.f32.xlu1 %v80_v2  ;;  %75 = vadd.xlane.f32.xlu0 %v74_v3  ;;  %v89_v8 = vmul.f32 %v777_v5, %v777_v5  ;;  %v77_v9 = vsel %vm70_vm0, %v777_v5, 0.0  ;;  %v71_v10 = vsel %vm70_vm0, %v783_v7, 0.0  ;;  %v87_v13 = vmul.f32 %v783_v7, %v783_v7  ;;  %v814_v61 = vld [vmem:[#allocation4] ss:$0 sm:$0xff] }
   0xe   :  { %v94_v6 = vsel %vm70_vm0, %v88_v4, 0.0  ;;  %v100_v14 = vsel %vm70_vm0, %v90_v12, 0.0  ;;  %v816_v63 = vshrl.u32 %v187_v55, 7 }
   0xf   :  { %95 = vadd.xlane.f32.xlu2 %v94_v6  ;;  %v97_v11 = vsel %vm70_vm0, %v89_v8, 0.0  ;;  %v91_v15 = vsel %vm70_vm0, %v87_v13, 0.0 }
  0x10   :  { %v190_v12 = vadd.s32 16, %v816_v63  ;;  %vm248_vm10 = vcmp.lt.s32.totalorder %v816_v63, 1  ;;  %vm273_vm14 = vcmp.lt.s32.totalorder %v816_v63, 7 }
  0x15   :  { %78 = vadd.xlane.f32.xlu0 %v77_v9  ;;  %72 = vadd.xlane.f32.xlu1 %v71_v10  ;;  %v579_v10 = vld [vmem:[%s938_s5 + $0x8] sm:$0xff] }
  0x16   :  { %584 = vmatpush.bf16.msra.mxu3 %v579_v10  ;;  %388 = vmatpush.bf16.msra.mxu0 %v579_v10 }
  0x17   :  { %98 = vadd.xlane.f32.xlu2 %v97_v11 }
  0x1d   :  { %101 = vadd.xlane.f32.xlu0 %v100_v14  ;;  %92 = vadd.xlane.f32.xlu1 %v91_v15 }
  0x80   :  { %v82_v16 = vpop.xlane.xlu1 %81  ;;  %v76_v17 = vpop.xlane.xlu0 %75 }
  0x81   :  { %v84_v18 = vmul.f32 0.03125, %v76_v17  ;;  %v802_v31 = vmul.f32 0.03125, %v82_v16  ;;  %v578_v17 = vld [vmem:[%s938_s5] sm:$0xff] }
  0x82   :  { %v96_v19 = vpop.xlane.xlu2 %95  ;;  %585 = vmatpush.bf16.msra.mxu3 %v578_v17  ;;  %389 = vmatpush.bf16.msra.mxu0 %v578_v17 }
  0x83   :  { %v108_v20 = vmul.f32 %v84_v18, %v84_v18  ;;  %v104_v21 = vmul.f32 0.03125, %v96_v19  ;;  %v110_v40 = vmul.f32 %v802_v31, %v802_v31  ;;  %v164_v58 = vsub.f32 %v766_v1, %v84_v18  ;;  %v596_v1 = vld [vmem:[%s935_s2] ss:$0 sm:$0xff] }
  0x84   :  { %v189_v18 = vadd.s32 8, %v816_v63 }
  0x85   :  { %v112_v22 = vsub.f32 %v104_v21, %v108_v20 }
  0x87   :  { %v116_v23 = vmax.f32 %v112_v22, 0.0 }
  0x88   :  { %v79_v24 = vpop.xlane.xlu0 %78  ;;  %v73_v25 = vpop.xlane.xlu1 %72 }
  0x89   :  { %v798_v26 = vmul.f32 0.03125, %v79_v24  ;;  %v120_v27 = vadd.f32 1e-05, %v116_v23  ;;  %v804_v32 = vmul.f32 0.03125, %v73_v25  ;;  %v210_v24 = vand.u32 15, %v190_v12 }
  0x8a   :  { %v99_v28 = vpop.xlane.xlu2 %98 }
  0x8b   :  { %v109_v29 = vmul.f32 %v798_v26, %v798_v26  ;;  %603 = vrsqrt.f32 %v120_v27  ;;  %v105_v30 = vmul.f32 0.03125, %v99_v28  ;;  %v107_v41 = vmul.f32 %v804_v32, %v804_v32 }
  0x8c   :  { %vm139_vm2 = vweird.f32 %v120_v27  ;;  %v165_v14 = vsub.f32 %v777_v5, %v798_v26  ;;  %v203_v28 = vand.u32 15, %v189_v18  ;;  %vm843_vm13 = vcmp.eq.s32.totalorder %v210_v24, 0 }
  0x8d   :  { %v113_v33 = vsub.f32 %v105_v30, %v109_v29  ;;  %v191_v29 = vadd.s32 24, %v816_v63 }
  0x8f   :  { %v117_v36 = vmax.f32 %v113_v33, 0.0 }
  0x90   :  { %v102_v34 = vpop.xlane.xlu0 %101  ;;  %v93_v35 = vpop.xlane.xlu1 %92 }
  0x91   :  { %v106_v37 = vmul.f32 0.03125, %v102_v34  ;;  %v103_v38 = vmul.f32 0.03125, %v93_v35  ;;  %v604_v39 = vpop.eup %603  ;;  %v121_v43 = vadd.f32 1e-05, %v117_v36  ;;  %v163_v35 = vsub.f32 %v783_v7, %v804_v32 }
  0x92   :  { %v134_v42 = vmul.f32 %v604_v39, %v120_v27  ;;  %vm140_vm1 = vweird.f32 %v604_v39  ;;  %v166_v27 = vsub.f32 %v761_v0, %v802_v31  ;;  %v196_v7 = vand.u32 15, %v816_v63 }
  0x93   :  { %v114_v44 = vsub.f32 %v106_v37, %v110_v40  ;;  %v111_v45 = vsub.f32 %v103_v38, %v107_v41  ;;  %605 = vrsqrt.f32 %v121_v43  ;;  %vm141_vm3 = vmor %vm139_vm2, %vm140_vm1  ;;  %vm149_vm5 = vweird.f32 %v121_v43  ;;  %v598_v37 = vld [vmem:[#allocation7] ss:$0 sm:$0xff] }
  0x94   :  { %v135_v46 = vmul.f32 %v604_v39, %v134_v42  ;;  %vm853_vm1 = vcmp.eq.s32.totalorder %v203_v28, 15  ;;  %vm864_vm2 = vcmp.eq.s32.totalorder %v196_v7, 0 }
  0x95   :  { %v118_v47 = vmax.f32 %v114_v44, 0.0  ;;  %v115_v48 = vmax.f32 %v111_v45, 0.0 }
  0x96   :  { %v136_v49 = vmul.f32 0.5, %v135_v46  ;;  %v217_v46 = vand.u32 15, %v191_v29 }
  0x97   :  { %v122_v50 = vadd.f32 1e-05, %v118_v47  ;;  %v810_v51 = vadd.f32 1e-05, %v115_v48 }
  0x98   :  { %v137_v52 = vsub.f32 1.5, %v136_v49 }
  0x99   :  { %607 = vrsqrt.f32 %v122_v50  ;;  %v606_v53 = vpop.eup %605  ;;  %vm159_vm8 = vweird.f32 %v122_v50  ;;  %vm129_vm12 = vweird.f32 %v810_v51 }
  0x9a   :  { %v138_v54 = vmul.f32 %v604_v39, %v137_v52  ;;  %609 = vrsqrt.f32 %v810_v51  ;;  %v144_v56 = vmul.f32 %v606_v53, %v121_v43  ;;  %vm150_vm4 = vweird.f32 %v606_v53  ;;  %v597_v43 = vld [vmem:[#allocation7 + $0x1] ss:$0 sm:$0xff] }
  0x9b   :  { %vm151_vm6 = vmor %vm149_vm5, %vm150_vm4  ;;  %vm328_vm4 = vcmask 257024   ;;  %vm475_vm5 = vcmask 523264  }
  0x9c   :  { %v142_v57 = vsel %vm141_vm3, %v604_v39, %v138_v54  ;;  %v145_v59 = vmul.f32 %v606_v53, %v144_v56  ;;  %vm871_vm3 = vcmp.eq.s32.totalorder %v217_v46, 15 }
  0x9d   :  { %v168_v62 = vmul.f32 %v164_v58, %v142_v57  ;;  %v599_v57 = vld [vmem:[#allocation7 + $0x2] ss:$0 sm:$0xff] }
  0x9e   :  { %v146_v2 = vmul.f32 0.5, %v145_v59 }
  0x9f   :  { %v608_v60 = vpop.eup %607  ;;  %v176_v11 = vmul.f32 %v814_v61, %v168_v62 }
  0xa0   :  { %v610_v3 = vpop.eup %609  ;;  %v154_v4 = vmul.f32 %v608_v60, %v122_v50  ;;  %v147_v6 = vsub.f32 1.5, %v146_v2  ;;  %vm160_vm7 = vweird.f32 %v608_v60 }
  0xa1   :  { %v124_v8 = vmul.f32 %v610_v3, %v810_v51  ;;  %v833_v23 = vadd.f32 %v596_v1, %v176_v11  ;;  %vm130_vm9 = vweird.f32 %v610_v3  ;;  %vm161_vm11 = vmor %vm159_vm8, %vm160_vm7 }
  0xa2   :  { %v155_v9 = vmul.f32 %v608_v60, %v154_v4  ;;  %v148_v13 = vmul.f32 %v606_v53, %v147_v6  ;;  %vm131_vm15 = vmor %vm129_vm12, %vm130_vm9  ;;  %v600_v6 = vld [vmem:[%s937_s4] ss:$0 sm:$0xff] }
  0xa3   :  { %v125_v16 = vmul.f32 %v610_v3, %v124_v8  ;;  %v245_v31 = vrot.slane %v833_v23, 7  ;;  %v270_v41 = vrot.slane %v833_v23, 1  ;;  %v299_v56 = vmul.f32 %v597_v43, %v833_v23 }
  0xa4   :  { %v156_v15 = vmul.f32 0.5, %v155_v9  ;;  %v152_v19 = vsel %vm151_vm6, %v606_v53, %v148_v13 }
  0xa5   :  { %v169_v20 = vmul.f32 %v165_v14, %v152_v19  ;;  %v126_v22 = vmul.f32 0.5, %v125_v16 }
  0xa6   :  { %v157_v21 = vsub.f32 1.5, %v156_v15 }
  0xa7   :  { %v177_v5 = vmul.f32 %v814_v61, %v169_v20  ;;  %v127_v26 = vsub.f32 1.5, %v126_v22 }
  0xa8   :  { %v158_v25 = vmul.f32 %v608_v60, %v157_v21 }
  0xa9   :  { %v185_v30 = vadd.f32 %v596_v1, %v177_v5  ;;  %v128_v34 = vmul.f32 %v610_v3, %v127_v26 }
  0xaa   :  { %v162_v33 = vsel %vm161_vm11, %v608_v60, %v158_v25 }
  0xab   :  { %v170_v0 = vmul.f32 %v166_v27, %v162_v33  ;;  %v246_v38 = vrot.slane %v185_v30, 7  ;;  %v271_v39 = vrot.slane %v185_v30, 1  ;;  %v132_v40 = vsel %vm131_vm15, %v610_v3, %v128_v34 }
  0xac   :  { %v167_v32 = vmul.f32 %v163_v35, %v132_v40  ;;  %v300_v59 = vmul.f32 %v597_v43, %v185_v30  ;;  %v601_v40 = vld [vmem:[%s939_s6] ss:$0 sm:$0xff]  ;;  %s699_s6 = smov [#allocation9]  }
  0xad   :  { %v178_v42 = vmul.f32 %v814_v61, %v170_v0  ;;  %v250_v45 = vsel %vm248_vm10, %v245_v31, %v246_v38  ;;  %v275_v48 = vsel %vm273_vm14, %v270_v41, %v271_v39 }
  0xae   :  { %v263_v47 = vsel %vm843_vm13, 0.0, %v250_v45  ;;  %v175_v50 = vmul.f32 %v814_v61, %v167_v32  ;;  %v287_v58 = vsel %vm853_vm1, 0.0, %v275_v48  ;;  %v602_v48 = vld [vmem:[%s941_s8] ss:$0 sm:$0xff] }
  0xaf   :  { %v186_v49 = vadd.f32 %v596_v1, %v178_v42  ;;  %v294_v51 = vmul.f32 %v598_v37, %v263_v47  ;;  %v309_v22 = vmul.f32 %v599_v57, %v287_v58  ;;  %337 = vst.msk [vmem:[#allocation3] sm:$0xff] %vm70_vm0, %v602_v48 }
  0xb0   :  { %v183_v55 = vadd.f32 %v596_v1, %v175_v50  ;;  %338 = vst.msk [vmem:[#allocation3 + $0x8] sm:$0xff] %vm70_vm0, %v602_v48 }
  0xb1   :  { %v247_v52 = vrot.slane %v186_v49, 7  ;;  %v272_v53 = vrot.slane %v186_v49, 1  ;;  %v304_v4 = vadd.f32 %v300_v59, %v294_v51  ;;  %v301_v9 = vmul.f32 %v597_v43, %v186_v49  ;;  %339 = vst.msk [vmem:[#allocation3 + $0x10] sm:$0xff] %vm70_vm0, %v602_v48 }
  0xb2   :  { %v244_v2 = vrot.slane %v183_v55, 7  ;;  %v269_v3 = vrot.slane %v183_v55, 1  ;;  %v298_v20 = vmul.f32 %v597_v43, %v183_v55  ;;  %340 = vst.msk [vmem:[#allocation3 + $0x18] sm:$0xff] %vm70_vm0, %v602_v48 }
  0xb3   :  { %v249_v61 = vsel %vm248_vm10, %v246_v38, %v247_v52  ;;  %v274_v62 = vsel %vm273_vm14, %v271_v39, %v272_v53  ;;  %v582_v38 = vld [vmem:[%s940_s7 + $0x10] sm:$0xff]  ;;  %v581_v39 = vld [vmem:[%s940_s7 + $0x8] sm:$0xff] }
  0xb4   :  { %v295_v8 = vmul.f32 %v598_v37, %v249_v61  ;;  %v310_v10 = vmul.f32 %v599_v57, %v274_v62  ;;  %v251_v1 = vsel %vm248_vm10, %v244_v2, %v245_v31  ;;  %v252_v11 = vsel %vm248_vm10, %v247_v52, %v244_v2 }
  0xb5   :  { %v276_v12 = vsel %vm273_vm14, %v269_v3, %v270_v41  ;;  %v277_v13 = vsel %vm273_vm14, %v272_v53, %v269_v3  ;;  %v261_v16 = vsel %vm864_vm2, 0.0, %v252_v11  ;;  %v293_v19 = vmul.f32 %v598_v37, %v251_v1  ;;  %v580_v41 = vld [vmem:[%s940_s7] sm:$0xff] }
  0xb6   :  { %v305_v14 = vadd.f32 %v301_v9, %v295_v8  ;;  %v314_v15 = vadd.f32 %v310_v10, %v304_v4  ;;  %v289_v17 = vsel %vm871_vm3, 0.0, %v277_v13  ;;  %v292_v18 = vmul.f32 %v598_v37, %v261_v16  ;;  %v583_v37 = vld [vmem:[%s940_s7 + $0x18] sm:$0xff]  ;;  %s524_s7 = sshll.u32 %s699_s6, 4  ;;  %s525_s7 = int_to_ptr.vmem [resolvable:$true] %s524_s7 }
  0xb7   :  { %v311_v21 = vmul.f32 %v599_v57, %v289_v17  ;;  %v303_v5 = vadd.f32 %v299_v56, %v293_v19  ;;  %v308_v25 = vmul.f32 %v599_v57, %v276_v12  ;;  %486 = vmatpush.bf16.msra.mxu1 %v583_v37  ;;  %586 = vmatpush.bf16.msra.mxu2 %v583_v37 }
  0xb8   :  { %v322_v23 = vadd.f32 %v600_v6, %v314_v15  ;;  %v302_v24 = vadd.f32 %v298_v20, %v292_v18 }
  0xb9   :  { %v315_v63 = vadd.f32 %v311_v21, %v305_v14  ;;  %v313_v28 = vadd.f32 %v309_v22, %v303_v5 }
  0xba   :  { %v326_v26 = vpack.c.bf16 %v322_v23, %v322_v23  ;;  %v312_v27 = vadd.f32 %v308_v25, %v302_v24 }
  0xbb   :  { %v323_v29 = vadd.f32 %v600_v6, %v315_v63  ;;  %v321_v33 = vadd.f32 %v600_v6, %v313_v28  ;;  %487 = vmatpush.bf16.msra.mxu1 %v582_v38  ;;  %587 = vmatpush.bf16.msra.mxu2 %v582_v38  ;;  %v437_v63 = vld [vmem:[#allocation3] sm:$0xff]  ;;  %v438_v28 = vld [vmem:[#allocation3 + $0x8] sm:$0xff] }
  0xbc   :  { %331 = vst.msk [vmem:[#allocation2 + $0x8] sm:$0xf] %vm328_vm4, %v326_v26  ;;  %v320_v30 = vadd.f32 %v600_v6, %v312_v27 }
  0xbd   :  { %v327_v34 = vpack.c.bf16 %v323_v29, %v323_v29  ;;  %v325_v36 = vpack.c.bf16 %v321_v33, %v321_v33  ;;  %v439_v29 = vld [vmem:[#allocation3 + $0x10] sm:$0xff] }
  0xbe   :  { %v324_v35 = vpack.c.bf16 %v320_v30, %v320_v30 }
  0xbf   :  { %332 = vst.msk [vmem:[#allocation2 + $0xc] sm:$0xf] %vm328_vm4, %v327_v34  ;;  %488 = vmatpush.bf16.msra.mxu1 %v581_v39  ;;  %588 = vmatpush.bf16.msra.mxu2 %v581_v39 }
  0xc0   :  { %329 = vst.msk [vmem:[#allocation2] sm:$0xf] %vm328_vm4, %v324_v35 }
  0xc1   :  { %330 = vst.msk [vmem:[#allocation2 + $0x4] sm:$0xf] %vm328_vm4, %v325_v36 }
  0xc3   :  { %489 = vmatpush.bf16.msra.mxu1 %v580_v41  ;;  %589 = vmatpush.bf16.msra.mxu2 %v580_v41 }
  0xc6   :  { %v577_v0 = vld [vmem:[#allocation2 + $0x8] sm:$0xff] }
  0xc7   :  { %557 = vmatmul.msk.bf16.vlgmr.msra.gmra.mxu3 %vm70_vm0, %v577_v0  ;;  %v440_v0 = vld [vmem:[#allocation3 + $0x18] sm:$0xff] }
  0xc8   :  { %v576_v31 = vld [vmem:[#allocation2] sm:$0xff] }
  0xc9   :  { %556 = vmatmul.msk.bf16.vlgmr.msra.gmra.mxu0 %vm70_vm0, %v576_v31 }
 0x146   :  { %v391_v42 = vpop.f32.mrf.mxu0 }
 0x147   :  { %v392_v7 = vadd.f32 %v601_v40, %v391_v42 }
 0x149   :  { %v401_v32 = vmul.f32 %v392_v7, %v392_v7 }
 0x14a   :  { %v396_v43 = vpop.f32.mrf.mxu3 }
 0x14b   :  { %v397_v44 = vadd.f32 %v601_v40, %v396_v43  ;;  %v405_v45 = vmul.f32 %v401_v32, %v392_v7 }
 0x14d   :  { %v403_v46 = vmul.f32 %v397_v44, %v397_v44  ;;  %v409_v47 = vmul.f32 0.044715, %v405_v45 }
 0x14e   :  { %v393_v50 = vpop.f32.mrf.mxu0 }
 0x14f   :  { %v407_v49 = vmul.f32 %v403_v46, %v397_v44  ;;  %v413_v51 = vadd.f32 %v409_v47, %v392_v7  ;;  %v394_v52 = vadd.f32 %v601_v40, %v393_v50 }
 0x151   :  { %v411_v53 = vmul.f32 0.044715, %v407_v49  ;;  %v417_v54 = vmul.f32 0.7978846, %v413_v51  ;;  %v402_v55 = vmul.f32 %v394_v52, %v394_v52 }
 0x152   :  { %v398_v56 = vpop.f32.mrf.mxu3 }
 0x153   :  { %v415_v57 = vadd.f32 %v411_v53, %v397_v44  ;;  %v399_v58 = vadd.f32 %v601_v40, %v398_v56  ;;  %v406_v59 = vmul.f32 %v402_v55, %v394_v52  ;;  %611 = vtanh.f32 %v417_v54 }
 0x155   :  { %v419_v60 = vmul.f32 0.7978846, %v415_v57  ;;  %v404_v61 = vmul.f32 %v399_v58, %v399_v58  ;;  %v410_v62 = vmul.f32 0.044715, %v406_v59 }
 0x157   :  { %v408_v2 = vmul.f32 %v404_v61, %v399_v58  ;;  %v414_v3 = vadd.f32 %v410_v62, %v394_v52  ;;  %613 = vtanh.f32 %v419_v60 }
 0x159   :  { %v412_v4 = vmul.f32 0.044715, %v408_v2  ;;  %v418_v6 = vmul.f32 0.7978846, %v414_v3  ;;  %v612_v9 = vpop.eup %611 }
 0x15a   :  { %v425_v11 = vadd.f32 1.0, %v612_v9 }
 0x15b   :  { %v416_v8 = vadd.f32 %v412_v4, %v399_v58  ;;  %615 = vtanh.f32 %v418_v6 }
 0x15c   :  { %v429_v15 = vmul.f32 0.5, %v425_v11 }
 0x15d   :  { %v420_v10 = vmul.f32 0.7978846, %v416_v8  ;;  %v614_v1 = vpop.eup %613 }
 0x15e   :  { %v427_v13 = vadd.f32 1.0, %v614_v1  ;;  %v433_v20 = vmul.f32 %v429_v15, %v392_v7 }
 0x15f   :  { %617 = vtanh.f32 %v420_v10 }
 0x160   :  { %v431_v19 = vmul.f32 0.5, %v427_v13 }
 0x161   :  { %v616_v12 = vpop.eup %615 }
 0x162   :  { %v426_v14 = vadd.f32 1.0, %v616_v12  ;;  %v435_v24 = vmul.f32 %v431_v19, %v397_v44 }
 0x164   :  { %v430_v17 = vmul.f32 0.5, %v426_v14 }
 0x165   :  { %v618_v16 = vpop.eup %617 }
 0x166   :  { %v428_v18 = vadd.f32 1.0, %v618_v16  ;;  %v434_v21 = vmul.f32 %v430_v17, %v394_v52 }
 0x168   :  { %v432_v22 = vmul.f32 0.5, %v428_v18  ;;  %v441_v23 = vpack.c.bf16 %v434_v21, %v433_v20 }
 0x16a   :  { %v436_v5 = vmul.f32 %v432_v22, %v399_v58  ;;  %574 = vmatmul.msk.bf16.vlgmr.msra.gmra.mxu1 %vm475_vm5, %v441_v23 }
 0x16c   :  { %v442_v25 = vpack.c.bf16 %v436_v5, %v435_v24 }
 0x16e   :  { %575 = vmatmul.msk.bf16.vlgmr.msra.gmra.mxu2 %vm475_vm5, %v442_v25 }
 0x1e7   :  { %v491_v26 = vpop.f32.mrf.mxu1 }
 0x1e8   :  { %v501_v27 = vadd.f32 %v491_v26, %v437_v63 }
 0x1ea   :  { %505 = vst.msk [vmem:[#allocation3] sm:$0xff] %vm70_vm0, %v501_v27 }
 0x1ef   :  { %v493_v30 = vpop.f32.mrf.mxu1 }
 0x1f0   :  { %v502_v33 = vadd.f32 %v493_v30, %v438_v28 }
 0x1f1   :  { %v496_v34 = vpop.f32.mrf.mxu2  ;;  %v512_v36 = vld [vmem:[#allocation3] sm:$0xff] }
 0x1f2   :  { %v503_v35 = vadd.f32 %v496_v34, %v439_v29  ;;  %506 = vst.msk [vmem:[#allocation3 + $0x8] sm:$0xff] %vm70_vm0, %v502_v33 }
 0x1f3   :  { %516 = vst.msk [vmem:[#allocation9] sm:$0xff] %vm70_vm0, %v512_v36 }
 0x1f4   :  { %507 = vst.msk [vmem:[#allocation3 + $0x10] sm:$0xff] %vm70_vm0, %v503_v35 }
 0x1f9   :  { %v498_v31 = vpop.f32.mrf.mxu2  ;;  %v513_v38 = vld [vmem:[#allocation3 + $0x8] sm:$0xff] }
 0x1fa   :  { %v504_v37 = vadd.f32 %v498_v31, %v440_v0  ;;  %517 = vst.msk [vmem:[#allocation9 + $0x8] sm:$0xff] %vm70_vm0, %v513_v38 }
 0x1fb   :  { %v514_v39 = vld [vmem:[#allocation3 + $0x10] sm:$0xff] }
 0x1fc   :  { %508 = vst.msk [vmem:[#allocation3 + $0x18] sm:$0xff] %vm70_vm0, %v504_v37 }
 0x1fd   :  { %518 = vst.msk [vmem:[#allocation9 + $0x10] sm:$0xff] %vm70_vm0, %v514_v39 }
 0x203   :  { %v515_v40 = vld [vmem:[#allocation3 + $0x18] sm:$0xff] }
 0x204   :  { %519 = vst.msk [vmem:[#allocation9 + $0x18] sm:$0xff] %vm70_vm0, %v515_v40 }
 0x205   :  { %532 = dma.vmem_to_hbm [thread:$0]  %s525_s7, 512, %s527_s20, [#allocation6], %s700_s21, %s700_s21, %s701_s3  }
 0x206   :  { %695 = dma.done.wait [#allocation6], 512  }
 0x207   :  { %696 = vsyncadd [#allocation6], 4294966784 }
 0x208   :  { %537 = vsyncpa [#allocation5], 1 }
 0x209   :  { %538 = vsyncpa [#allocation8], 1 }
 0x20a   :  { %539 = vsyncpa [#allocation6], 1 }

</bundles_post_ra>
